<compile_context>
chip_gen: v7x
topology: tpu7x:2x2x1
jax: 0.10.0
libtpu: 0.0.40
codegen_flags: <defaults>
</compile_context>

<pallas_src>
import numpy as np

import jax
import jax.numpy as jnp
from jax import lax
from jax.experimental import pallas as pl
from jax.experimental.pallas import tpu as pltpu

INPUT_SIZE = 64      # must be divisible by 8
HIDDEN = 32
NUM_CLASSES = 10
BATCH = 2
EPS = 1e-5


# --------------------------------------------------------------------------- #
# Packed-constant layout (static offsets, 8-sublane aligned sections)
# --------------------------------------------------------------------------- #
def _align8(n):
    return (n + 7) // 8 * 8


def _layout(B, L, H2, H):
    L1, L2, L3 = L // 2, L // 4, L // 8
    p1 = _align8(B * (L1 + 2))     # pool1 even/odd half rows (8-aligned)
    p2 = _align8(B * (L2 + 2))
    p3 = _align8(B * L3)
    sections = [
        ('w1c', 8),            # (8, 32)    conv1 taps (rows 5..7 zero)
        ('w2c', 3 * 32),       # (96, 64)   conv2, row = t*32 + cin
        ('w3c', 3 * 64),       # (192, 128) conv3, row = t*64 + cin
        ('w2f', H2),           # (64, 32)
        ('w3f', H),            # (32, 128)  fc3 weight, classes zero-padded
        ('sh', 11),            # s1,h1,s2,h2,s3,h3,s4,h4,s5,h5,b6 (one per row)
        ('sel1', 2 * p1),      # fused even|odd pool1 selection (block-diag over B)
        ('sel2', 2 * p2),
        ('sel3', 2 * p3),
    ]
    off, r = {}, 0
    for name, rows in sections:
        off[name] = r
        r += _align8(rows)
    return off, r


def _pool_sel_packed(lin, pad, B):
    # MaxPool1d(k=2,s=2) plus the next conv's zero padding, as ONE stacked
    # selection matrix.  Rows are position-major / batch-minor (r = i*B + b).
    # Even half lives in rows [0, half), odd half in rows [half_pad, half_pad+half)
    # so both halves start at an 8-aligned sublane offset.  Zero rows = conv pad.
    lout = lin // 2
    half = B * (lout + 2 * pad)
    half_pad = _align8(half)
    sel = np.zeros((2 * half_pad, B * lin), np.float32)
    for j in range(lout + 2 * pad):
        p = j - pad
        if 0 <= p < lout:
            for b in range(B):
                sel[j * B + b, (2 * p) * B + b] = 1.0
                sel[half_pad + j * B + b, (2 * p + 1) * B + b] = 1.0
    return sel


# --------------------------------------------------------------------------- #
# Kernel (whole batch in a single invocation; batch interleaved on sublanes)
# --------------------------------------------------------------------------- #
def _make_kernel(off, B, L, H2, H):
    L1, L2, L3 = L // 2, L // 4, L // 8
    f32 = jnp.float32
    half1, half1p = B * (L1 + 2), _align8(B * (L1 + 2))
    half2, half2p = B * (L2 + 2), _align8(B * (L2 + 2))
    half3, half3p = B * L3, _align8(B * L3)

    def kernel(x_ref, w1f_ref, c_ref, out_ref, flat_ref):
        # x_ref:    (B*L, 8)      im2col'd conv1 input (row = i*B + b, lane = tap)
        # w1f_ref:  (L3*128, H2)  fc1 weight (zero-free, separate operand)
        # c_ref:    (R, 128)      packed constants
        # out_ref:  (B, 128)      lane-dense logits (classes in lanes [0, NC))
        # flat_ref: (B, L3*128)   VMEM scratch for the flattened conv features

        def row(name, idx, cols):
            o = off[name] + idx
            return c_ref[o:o + 1, :cols]

        def blk(name, start, rows, cols):
            o = off[name] + start
            return c_ref[o:o + rows, :cols]

        # folded-BN scale/shift and fc3 bias (one row each); read once (hoisted)
        s1, h1 = row('sh', 0, 32), row('sh', 1, 32)
        s2, h2 = row('sh', 2, 64), row('sh', 3, 64)
        s3, h3 = row('sh', 4, 128), row('sh', 5, 128)
        s4, h4 = row('sh', 6, H2), row('sh', 7, H2)
        s5, h5 = row('sh', 8, H), row('sh', 9, H)
        b6 = row('sh', 10, 128)

        def pool(y, name, half, half_pad, cols):
            # MaxPool1d(k=2,s=2) (+ next conv's zero pad) as one selection matmul.
            r = jnp.dot(blk(name, 0, 2 * half_pad, cols), y,
                        preferred_element_type=f32)
            return jnp.maximum(r[:half], r[half_pad:half_pad + half])

        # ---- conv1 (k=5, pad=2, 1->32): host-side im2col -> one dot ------------ #
        y1 = jnp.maximum(
            jnp.dot(x_ref[...], blk('w1c', 0, 8, 32),
                    preferred_element_type=f32) * s1 + h1, 0.0)       # (B*L, 32)
        p1 = pool(y1, 'sel1', half1, half1p, B * L)                   # (B*(L1+2), 32)

        # ---- conv2 (k=3, pad=1, 32->64): contiguous tap windows over batch ----- #
        acc2 = jnp.dot(p1[0:B * L1, :], blk('w2c', 0, 32, 64),
                       preferred_element_type=f32)
        for t in (1, 2):
            acc2 = acc2 + jnp.dot(p1[t * B:t * B + B * L1, :],
                                  blk('w2c', 32 * t, 32, 64),
                                  preferred_element_type=f32)
        y2 = jnp.maximum(acc2 * s2 + h2, 0.0)                         # (B*L1, 64)
        p2 = pool(y2, 'sel2', half2, half2p, B * L1)                  # (B*(L2+2), 64)

        # ---- conv3 (k=3, pad=1, 64->128) ---------------------------------------- #
        acc3 = jnp.dot(p2[0:B * L2, :], blk('w3c', 0, 64, 128),
                       preferred_element_type=f32)
        for t in (1, 2):
            acc3 = acc3 + jnp.dot(p2[t * B:t * B + B * L2, :],
                                  blk('w3c', 64 * t, 64, 128),
                                  preferred_element_type=f32)
        y3 = jnp.maximum(acc3 * s3 + h3, 0.0)                         # (B*L2, 128)
        p3 = pool(y3, 'sel3', half3, half3p, B * L2)                  # (B*L3, 128)

        # ---- flatten: flat[b, l*128 + c] = p3[l*B + b, c] ----------------------- #
        # (torch's channel-major .view is absorbed into the w1f row order)
        for l in range(L3):
            flat_ref[:, 128 * l:128 * (l + 1)] = p3[l * B:(l + 1) * B, :]

        # ---- fc1 + bn4 + relu: ONE K = L3*128 dot (zero-free w1f operand) ------- #
        z4 = jnp.maximum(
            jnp.dot(flat_ref[...], w1f_ref[...],
                    preferred_element_type=f32) * s4 + h4, 0.0)       # (B, 2H)
        # dropout1: identity (eval)

        # ---- fc2 + bn5 + relu ----------------------------------------------------#
        z5 = jnp.maximum(
            jnp.dot(z4, blk('w2f', 0, H2, H),
                    preferred_element_type=f32) * s5 + h5, 0.0)       # (B, H)
        # dropout2: identity (eval)

        # ---- fc3 (lane-dense store; unused class lanes are zero) ---------------- #
        out_ref[...] = jnp.dot(z5, blk('w3f', 0, H, 128),
                               preferred_element_type=f32) + b6

    return kernel


# --------------------------------------------------------------------------- #
# Parameters (deterministic, synthetic)
# --------------------------------------------------------------------------- #
def init_params(key):
    def nrm(k, shape, scale=0.1):
        return (scale * jax.random.normal(k, shape)).astype(jnp.float32)

    def bn_params(k, c):
        k1, k2, k3, k4 = jax.random.split(k, 4)
        return dict(g=1.0 + nrm(k1, (c,)), be=nrm(k2, (c,)), m=nrm(k3, (c,)),
                    v=jax.random.uniform(k4, (c,), minval=0.5, maxval=1.5,
                                         dtype=jnp.float32))

    keys = jax.random.split(key, 16)
    fc_in = (INPUT_SIZE // 8) * 128
    P = {}
    P['c1'] = dict(w=nrm(keys[0], (32, 1, 5)), b=nrm(keys[1], (32,)), bn=bn_params(keys[2], 32))
    P['c2'] = dict(w=nrm(keys[3], (64, 32, 3)), b=nrm(keys[4], (64,)), bn=bn_params(keys[5], 64))
    P['c3'] = dict(w=nrm(keys[6], (128, 64, 3)), b=nrm(keys[7], (128,)), bn=bn_params(keys[8], 128))
    P['f1'] = dict(w=nrm(keys[9], (2 * HIDDEN, fc_in)), b=nrm(keys[10], (2 * HIDDEN,)),
                   bn=bn_params(keys[11], 2 * HIDDEN))
    P['f2'] = dict(w=nrm(keys[12], (HIDDEN, 2 * HIDDEN)), b=nrm(keys[13], (HIDDEN,)),
                   bn=bn_params(keys[14], HIDDEN))
    ka, kb = jax.random.split(keys[15])
    P['f3'] = dict(w=nrm(ka, (NUM_CLASSES, HIDDEN)), b=nrm(kb, (NUM_CLASSES,)))
    return P


def _fold_bn(bias, bn):
    # bn(conv(x) + bias) == scale * conv(x) + shift   (eval-mode BN)
    s = np.asarray(bn['g']) / np.sqrt(np.asarray(bn['v']) + EPS)
    h = np.asarray(bn['be']) + s * (np.asarray(bias) - np.asarray(bn['m']))
    return s.astype(np.float32), h.astype(np.float32)


# --------------------------------------------------------------------------- #
# One-time host-side packing (deliberately OUTSIDE the jitted forward path)
# --------------------------------------------------------------------------- #
def pack_params(P, B=BATCH, L=INPUT_SIZE):
    H2 = int(P['f1']['w'].shape[0])
    H = int(P['f2']['w'].shape[0])
    NC = int(P['f3']['w'].shape[0])
    L1, L2, L3 = L // 2, L // 4, L // 8
    assert int(P['f1']['w'].shape[1]) == L3 * 128
    off, R = _layout(B, L, H2, H)

    def A(a):
        return np.asarray(a, np.float32)

    w1c = np.zeros((8, 32), np.float32)
    w1c[:5] = A(P['c1']['w'])[:, 0, :].T                                   # (5, 32)
    w2c = np.transpose(A(P['c2']['w']), (2, 1, 0)).reshape(3 * 32, 64)     # [t*32+cin, cout]
    w3c = np.transpose(A(P['c3']['w']), (2, 1, 0)).reshape(3 * 64, 128)
    # torch flattens (B, 128, L3) channel-major: w1f[l*128+c, o] == W_torch[o, c*L3+l]
    w1f = np.transpose(A(P['f1']['w']).reshape(H2, 128, L3),
                       (2, 1, 0)).reshape(L3 * 128, H2)
    w2f = A(P['f2']['w']).T                                                # (H2, H)
    w3f = np.zeros((H, 128), np.float32)
    w3f[:, :NC] = A(P['f3']['w']).T                                        # lane-padded

    sh = np.zeros((11, 128), np.float32)
    pairs = [_fold_bn(P['c1']['b'], P['c1']['bn']),
             _fold_bn(P['c2']['b'], P['c2']['bn']),
             _fold_bn(P['c3']['b'], P['c3']['bn']),
             _fold_bn(P['f1']['b'], P['f1']['bn']),
             _fold_bn(P['f2']['b'], P['f2']['bn'])]
    rows = [v for pair in pairs for v in pair] + [A(P['f3']['b'])]
    for i, v in enumerate(rows):
        sh[i, :v.shape[0]] = v

    consts = np.zeros((R, 128), np.float32)

    def put(name, a):
        r, c = a.shape
        consts[off[name]:off[name] + r, :c] = a

    put('w1c', w1c); put('w2c', w2c); put('w3c', w3c)
    put('w2f', w2f); put('w3f', w3f); put('sh', sh)
    put('sel1', _pool_sel_packed(L, 1, B))
    put('sel2', _pool_sel_packed(L1, 1, B))
    put('sel3', _pool_sel_packed(L2, 0, B))

    return {'consts': jnp.asarray(consts), 'w1f': jnp.asarray(w1f)}


# --------------------------------------------------------------------------- #
# Jitted forward: tiny im2col glue + one pallas_call
# --------------------------------------------------------------------------- #
@jax.jit
def fingerprint_forward_pallas(x, packed):
    consts, w1f = packed['consts'], packed['w1f']
    B, L = x.shape
    assert L % 8 == 0
    L3 = L // 8
    H2 = int(w1f.shape[1])
    H, NC = HIDDEN, NUM_CLASSES
    off, R = _layout(B, L, H2, H)
    assert R == consts.shape[0]

    # glue: im2col for conv1 (k=5, pad=2); row = i*B + b (batch-minor), lane = tap
    xpad = jnp.pad(x.astype(jnp.float32), ((0, 0), (2, 2)))               # (B, L+4)
    cols = jnp.stack([xpad[:, t:t + L] for t in range(5)], axis=-1)       # (B, L, 5)
    cols = jnp.pad(cols, ((0, 0), (0, 0), (0, 3)))                        # (B, L, 8)
    x_col = jnp.transpose(cols, (1, 0, 2)).reshape(B * L, 8)              # (B*L, 8)

    kernel = _make_kernel(off, B, L, H2, H)

    grid_spec = pltpu.PrefetchScalarGridSpec(
        num_scalar_prefetch=0,
        grid=(1,),                                        # whole batch, one step
        in_specs=[pl.BlockSpec((B * L, 8), lambda i: (0, 0)),
                  pl.BlockSpec((L3 * 128, H2), lambda i: (0, 0)),
                  pl.BlockSpec((R, 128), lambda i: (0, 0))],
        out_specs=pl.BlockSpec((B, 128), lambda i: (0, 0)),
        scratch_shapes=[pltpu.VMEM((B, L3 * 128), jnp.float32)])

    out = pl.pallas_call(
        kernel,
        out_shape=jax.ShapeDtypeStruct((B, 128), jnp.float32),
        grid_spec=grid_spec,
        compiler_params=pltpu.CompilerParams(dimension_semantics=("arbitrary",)),
    )(x_col, w1f, consts)
    return out[:, :NC]


# --------------------------------------------------------------------------- #
# Pure-JAX reference (mirrors the PyTorch forward, eval mode)
# --------------------------------------------------------------------------- #
def reference_forward(x, P):
    HI = lax.Precision.HIGHEST

    def conv1d(y, w, b, pad):
        dn = lax.conv_dimension_numbers(y.shape, w.shape, ('NCH', 'OIH', 'NCH'))
        out = lax.conv_general_dilated(y, w, window_strides=(1,), padding=[(pad, pad)],
                                       dimension_numbers=dn, precision=HI)
        return out + b[None, :, None]

    def bn3(y, bn):
        return (bn['g'][None, :, None] * (y - bn['m'][None, :, None])
                / jnp.sqrt(bn['v'] + EPS)[None, :, None] + bn['be'][None, :, None])

    def pool(y):
        B, C, L = y.shape
        return y.reshape(B, C, L // 2, 2).max(axis=-1)

    def bn1d(y, bn):
        return bn['g'] * (y - bn['m']) / jnp.sqrt(bn['v'] + EPS) + bn['be']

    h = x[:, None, :]
    h = pool(jnp.maximum(bn3(conv1d(h, P['c1']['w'], P['c1']['b'], 2), P['c1']['bn']), 0.0))
    h = pool(jnp.maximum(bn3(conv1d(h, P['c2']['w'], P['c2']['b'], 1), P['c2']['bn']), 0.0))
    h = pool(jnp.maximum(bn3(conv1d(h, P['c3']['w'], P['c3']['b'], 1), P['c3']['bn']), 0.0))
    h = h.reshape(x.shape[0], -1)                     # channel-major flatten, like .view
    h = jnp.maximum(bn1d(jnp.dot(h, P['f1']['w'].T, precision=HI) + P['f1']['b'],
                         P['f1']['bn']), 0.0)
    h = jnp.maximum(bn1d(jnp.dot(h, P['f2']['w'].T, precision=HI) + P['f2']['b'],
                         P['f2']['bn']), 0.0)
    return jnp.dot(h, P['f3']['w'].T, precision=HI) + P['f3']['b']


# --------------------------------------------------------------------------- #
if __name__ == "__main__":
    key = jax.random.PRNGKey(0)
    kp, kx = jax.random.split(key)
    params = init_params(kp)
    x = jax.random.normal(kx, (BATCH, INPUT_SIZE), dtype=jnp.float32)

    packed = pack_params(params)                 # one-time packing, outside jit
    out = jax.block_until_ready(fingerprint_forward_pallas(x, packed))

    ref = reference_forward(x, params)
    err = float(jnp.max(jnp.abs(out - ref)))
    if out.shape != (BATCH, NUM_CLASSES) or not (err < 5e-3):
        raise SystemExit(f"MISMATCH: shape={out.shape}, max_abs_err={err}")
    print("KERNEL_OK")
</pallas_src>

<mosaic_0001>
module attributes {stable_mosaic.version = 11 : i64} {
  func.func @kernel(%arg0: i32, %arg1: memref<128x8xf32, #tpu.memory_space<vmem>>, %arg2: memref<1024x64xf32, #tpu.memory_space<vmem>>, %arg3: memref<664x128xf32, #tpu.memory_space<vmem>>, %arg4: memref<2x128xf32, #tpu.memory_space<vmem>>, %arg5: memref<2x1024xf32, #tpu.memory_space<vmem>>) attributes {dimension_semantics = [#tpu.dimension_semantics<arbitrary>], iteration_bounds = array<i64: 1>, scalar_prefetch = 0 : i64, scratch_operands = 1 : i64, tpu.core_type = #tpu.core_type<tc>, window_params = [{pipeline_mode = #tpu.pipeline_mode<synchronous>, transform_indices = @transform_0, window_bounds = array<i64: 128, 8>}, {pipeline_mode = #tpu.pipeline_mode<synchronous>, transform_indices = @transform_1, window_bounds = array<i64: 1024, 64>}, {pipeline_mode = #tpu.pipeline_mode<synchronous>, transform_indices = @transform_2, window_bounds = array<i64: 664, 128>}, {pipeline_mode = #tpu.pipeline_mode<synchronous>, transform_indices = @transform_3, window_bounds = array<i64: 2, 128>}]} {
    %c392 = arith.constant 392 : index
    %c0 = arith.constant 0 : index
    %0 = vector.load %arg3[%c392, %c0] : memref<664x128xf32, #tpu.memory_space<vmem>>, vector<1x32xf32>
    %c393 = arith.constant 393 : index
    %c0_0 = arith.constant 0 : index
    %1 = vector.load %arg3[%c393, %c0_0] : memref<664x128xf32, #tpu.memory_space<vmem>>, vector<1x32xf32>
    %c394 = arith.constant 394 : index
    %c0_1 = arith.constant 0 : index
    %2 = vector.load %arg3[%c394, %c0_1] : memref<664x128xf32, #tpu.memory_space<vmem>>, vector<1x64xf32>
    %c395 = arith.constant 395 : index
    %c0_2 = arith.constant 0 : index
    %3 = vector.load %arg3[%c395, %c0_2] : memref<664x128xf32, #tpu.memory_space<vmem>>, vector<1x64xf32>
    %c396 = arith.constant 396 : index
    %c0_3 = arith.constant 0 : index
    %4 = vector.load %arg3[%c396, %c0_3] : memref<664x128xf32, #tpu.memory_space<vmem>>, vector<1x128xf32>
    %c397 = arith.constant 397 : index
    %c0_4 = arith.constant 0 : index
    %5 = vector.load %arg3[%c397, %c0_4] : memref<664x128xf32, #tpu.memory_space<vmem>>, vector<1x128xf32>
    %c398 = arith.constant 398 : index
    %c0_5 = arith.constant 0 : index
    %6 = vector.load %arg3[%c398, %c0_5] : memref<664x128xf32, #tpu.memory_space<vmem>>, vector<1x64xf32>
    %c399 = arith.constant 399 : index
    %c0_6 = arith.constant 0 : index
    %7 = vector.load %arg3[%c399, %c0_6] : memref<664x128xf32, #tpu.memory_space<vmem>>, vector<1x64xf32>
    %c400 = arith.constant 400 : index
    %c0_7 = arith.constant 0 : index
    %8 = vector.load %arg3[%c400, %c0_7] : memref<664x128xf32, #tpu.memory_space<vmem>>, vector<1x32xf32>
    %c401 = arith.constant 401 : index
    %c0_8 = arith.constant 0 : index
    %9 = vector.load %arg3[%c401, %c0_8] : memref<664x128xf32, #tpu.memory_space<vmem>>, vector<1x32xf32>
    %c402 = arith.constant 402 : index
    %c0_9 = arith.constant 0 : index
    %10 = vector.load %arg3[%c402, %c0_9] : memref<664x128xf32, #tpu.memory_space<vmem>>, vector<1x128xf32>
    %c0_10 = arith.constant 0 : index
    %c0_11 = arith.constant 0 : index
    %11 = vector.load %arg1[%c0_10, %c0_11] : memref<128x8xf32, #tpu.memory_space<vmem>>, vector<128x8xf32>
    %c0_12 = arith.constant 0 : index
    %c0_13 = arith.constant 0 : index
    %12 = vector.load %arg3[%c0_12, %c0_13] : memref<664x128xf32, #tpu.memory_space<vmem>>, vector<8x32xf32>
    %cst = arith.constant dense<0.000000e+00> : vector<128x32xf32>
    %13 = tpu.matmul %11, %12, %cst {dimension_numbers = #tpu.dot_dimension_numbers<[1], [0], [0], [1], [0, 0, 1, 1], [], []>} : vector<128x8xf32>, vector<8x32xf32>, vector<128x32xf32> -> vector<128x32xf32>
    %14 = vector.broadcast %0 : vector<1x32xf32> to vector<128x32xf32>
    %15 = arith.mulf %13, %14 : vector<128x32xf32>
    %16 = vector.broadcast %1 : vector<1x32xf32> to vector<128x32xf32>
    %17 = arith.addf %15, %16 : vector<128x32xf32>
    %cst_14 = arith.constant 0.000000e+00 : f32
    %18 = vector.broadcast %cst_14 : f32 to vector<128x32xf32>
    %19 = arith.maximumf %17, %18 : vector<128x32xf32>
    %c408 = arith.constant 408 : index
    %c0_15 = arith.constant 0 : index
    %20 = vector.load %arg3[%c408, %c0_15] : memref<664x128xf32, #tpu.memory_space<vmem>>, vector<144x128xf32>
    %cst_16 = arith.constant dense<0.000000e+00> : vector<144x32xf32>
    %21 = tpu.matmul %20, %19, %cst_16 {dimension_numbers = #tpu.dot_dimension_numbers<[1], [0], [0], [1], [0, 0, 1, 1], [], []>} : vector<144x128xf32>, vector<128x32xf32>, vector<144x32xf32> -> vector<144x32xf32>
    %22 = vector.extract_strided_slice %21 {offsets = [0, 0], sizes = [68, 32], strides = [1, 1]} : vector<144x32xf32> to vector<68x32xf32>
    %23 = vector.extract_strided_slice %21 {offsets = [72, 0], sizes = [68, 32], strides = [1, 1]} : vector<144x32xf32> to vector<68x32xf32>
    %24 = arith.maximumf %22, %23 : vector<68x32xf32>
    %25 = vector.extract_strided_slice %24 {offsets = [0, 0], sizes = [64, 32], strides = [1, 1]} : vector<68x32xf32> to vector<64x32xf32>
    %c8 = arith.constant 8 : index
    %c0_17 = arith.constant 0 : index
    %26 = vector.load %arg3[%c8, %c0_17] : memref<664x128xf32, #tpu.memory_space<vmem>>, vector<32x64xf32>
    %cst_18 = arith.constant dense<0.000000e+00> : vector<64x64xf32>
    %27 = tpu.matmul %25, %26, %cst_18 {dimension_numbers = #tpu.dot_dimension_numbers<[1], [0], [0], [1], [0, 0, 1, 1], [], []>} : vector<64x32xf32>, vector<32x64xf32>, vector<64x64xf32> -> vector<64x64xf32>
    %28 = vector.extract_strided_slice %24 {offsets = [2, 0], sizes = [64, 32], strides = [1, 1]} : vector<68x32xf32> to vector<64x32xf32>
    %c40 = arith.constant 40 : index
    %c0_19 = arith.constant 0 : index
    %29 = vector.load %arg3[%c40, %c0_19] : memref<664x128xf32, #tpu.memory_space<vmem>>, vector<32x64xf32>
    %cst_20 = arith.constant dense<0.000000e+00> : vector<64x64xf32>
    %30 = tpu.matmul %28, %29, %cst_20 {dimension_numbers = #tpu.dot_dimension_numbers<[1], [0], [0], [1], [0, 0, 1, 1], [], []>} : vector<64x32xf32>, vector<32x64xf32>, vector<64x64xf32> -> vector<64x64xf32>
    %31 = arith.addf %27, %30 : vector<64x64xf32>
    %32 = vector.extract_strided_slice %24 {offsets = [4, 0], sizes = [64, 32], strides = [1, 1]} : vector<68x32xf32> to vector<64x32xf32>
    %c72 = arith.constant 72 : index
    %c0_21 = arith.constant 0 : index
    %33 = vector.load %arg3[%c72, %c0_21] : memref<664x128xf32, #tpu.memory_space<vmem>>, vector<32x64xf32>
    %cst_22 = arith.constant dense<0.000000e+00> : vector<64x64xf32>
    %34 = tpu.matmul %32, %33, %cst_22 {dimension_numbers = #tpu.dot_dimension_numbers<[1], [0], [0], [1], [0, 0, 1, 1], [], []>} : vector<64x32xf32>, vector<32x64xf32>, vector<64x64xf32> -> vector<64x64xf32>
    %35 = arith.addf %31, %34 : vector<64x64xf32>
    %36 = vector.broadcast %2 : vector<1x64xf32> to vector<64x64xf32>
    %37 = arith.mulf %35, %36 : vector<64x64xf32>
    %38 = vector.broadcast %3 : vector<1x64xf32> to vector<64x64xf32>
    %39 = arith.addf %37, %38 : vector<64x64xf32>
    %cst_23 = arith.constant 0.000000e+00 : f32
    %40 = vector.broadcast %cst_23 : f32 to vector<64x64xf32>
    %41 = arith.maximumf %39, %40 : vector<64x64xf32>
    %c552 = arith.constant 552 : index
    %c0_24 = arith.constant 0 : index
    %42 = vector.load %arg3[%c552, %c0_24] : memref<664x128xf32, #tpu.memory_space<vmem>>, vector<80x64xf32>
    %cst_25 = arith.constant dense<0.000000e+00> : vector<80x64xf32>
    %43 = tpu.matmul %42, %41, %cst_25 {dimension_numbers = #tpu.dot_dimension_numbers<[1], [0], [0], [1], [0, 0, 1, 1], [], []>} : vector<80x64xf32>, vector<64x64xf32>, vector<80x64xf32> -> vector<80x64xf32>
    %44 = vector.extract_strided_slice %43 {offsets = [0, 0], sizes = [36, 64], strides = [1, 1]} : vector<80x64xf32> to vector<36x64xf32>
    %45 = vector.extract_strided_slice %43 {offsets = [40, 0], sizes = [36, 64], strides = [1, 1]} : vector<80x64xf32> to vector<36x64xf32>
    %46 = arith.maximumf %44, %45 : vector<36x64xf32>
    %47 = vector.extract_strided_slice %46 {offsets = [0, 0], sizes = [32, 64], strides = [1, 1]} : vector<36x64xf32> to vector<32x64xf32>
    %c104 = arith.constant 104 : index
    %c0_26 = arith.constant 0 : index
    %48 = vector.load %arg3[%c104, %c0_26] : memref<664x128xf32, #tpu.memory_space<vmem>>, vector<64x128xf32>
    %cst_27 = arith.constant dense<0.000000e+00> : vector<32x128xf32>
    %49 = tpu.matmul %47, %48, %cst_27 {dimension_numbers = #tpu.dot_dimension_numbers<[1], [0], [0], [1], [0, 0, 1, 1], [], []>} : vector<32x64xf32>, vector<64x128xf32>, vector<32x128xf32> -> vector<32x128xf32>
    %50 = vector.extract_strided_slice %46 {offsets = [2, 0], sizes = [32, 64], strides = [1, 1]} : vector<36x64xf32> to vector<32x64xf32>
    %c168 = arith.constant 168 : index
    %c0_28 = arith.constant 0 : index
    %51 = vector.load %arg3[%c168, %c0_28] : memref<664x128xf32, #tpu.memory_space<vmem>>, vector<64x128xf32>
    %cst_29 = arith.constant dense<0.000000e+00> : vector<32x128xf32>
    %52 = tpu.matmul %50, %51, %cst_29 {dimension_numbers = #tpu.dot_dimension_numbers<[1], [0], [0], [1], [0, 0, 1, 1], [], []>} : vector<32x64xf32>, vector<64x128xf32>, vector<32x128xf32> -> vector<32x128xf32>
    %53 = arith.addf %49, %52 : vector<32x128xf32>
    %54 = vector.extract_strided_slice %46 {offsets = [4, 0], sizes = [32, 64], strides = [1, 1]} : vector<36x64xf32> to vector<32x64xf32>
    %c232 = arith.constant 232 : index
    %c0_30 = arith.constant 0 : index
    %55 = vector.load %arg3[%c232, %c0_30] : memref<664x128xf32, #tpu.memory_space<vmem>>, vector<64x128xf32>
    %cst_31 = arith.constant dense<0.000000e+00> : vector<32x128xf32>
    %56 = tpu.matmul %54, %55, %cst_31 {dimension_numbers = #tpu.dot_dimension_numbers<[1], [0], [0], [1], [0, 0, 1, 1], [], []>} : vector<32x64xf32>, vector<64x128xf32>, vector<32x128xf32> -> vector<32x128xf32>
    %57 = arith.addf %53, %56 : vector<32x128xf32>
    %58 = vector.broadcast %4 : vector<1x128xf32> to vector<32x128xf32>
    %59 = arith.mulf %57, %58 : vector<32x128xf32>
    %60 = vector.broadcast %5 : vector<1x128xf32> to vector<32x128xf32>
    %61 = arith.addf %59, %60 : vector<32x128xf32>
    %cst_32 = arith.constant 0.000000e+00 : f32
    %62 = vector.broadcast %cst_32 : f32 to vector<32x128xf32>
    %63 = arith.maximumf %61, %62 : vector<32x128xf32>
    %c632 = arith.constant 632 : index
    %c0_33 = arith.constant 0 : index
    %64 = vector.load %arg3[%c632, %c0_33] : memref<664x128xf32, #tpu.memory_space<vmem>>, vector<32x32xf32>
    %cst_34 = arith.constant dense<0.000000e+00> : vector<32x128xf32>
    %65 = tpu.matmul %64, %63, %cst_34 {dimension_numbers = #tpu.dot_dimension_numbers<[1], [0], [0], [1], [0, 0, 1, 1], [], []>} : vector<32x32xf32>, vector<32x128xf32>, vector<32x128xf32> -> vector<32x128xf32>
    %66 = vector.extract_strided_slice %65 {offsets = [0, 0], sizes = [16, 128], strides = [1, 1]} : vector<32x128xf32> to vector<16x128xf32>
    %67 = vector.extract_strided_slice %65 {offsets = [16, 0], sizes = [16, 128], strides = [1, 1]} : vector<32x128xf32> to vector<16x128xf32>
    %68 = arith.maximumf %66, %67 : vector<16x128xf32>
    %69 = vector.extract_strided_slice %68 {offsets = [0, 0], sizes = [2, 128], strides = [1, 1]} : vector<16x128xf32> to vector<2x128xf32>
    %c0_35 = arith.constant 0 : index
    %c0_36 = arith.constant 0 : index
    %70 = vector.load %arg5[%c0_35, %c0_36] : memref<2x1024xf32, #tpu.memory_space<vmem>>, vector<2x128xf32>
    tpu.vector_store %arg5[%c0_35, %c0_36], %69 {strides = array<i32>} : memref<2x1024xf32, #tpu.memory_space<vmem>>, vector<2x128xf32>,
    %71 = vector.extract_strided_slice %68 {offsets = [2, 0], sizes = [2, 128], strides = [1, 1]} : vector<16x128xf32> to vector<2x128xf32>
    %c0_37 = arith.constant 0 : index
    %c128 = arith.constant 128 : index
    %72 = vector.load %arg5[%c0_37, %c128] : memref<2x1024xf32, #tpu.memory_space<vmem>>, vector<2x128xf32>
    tpu.vector_store %arg5[%c0_37, %c128], %71 {strides = array<i32>} : memref<2x1024xf32, #tpu.memory_space<vmem>>, vector<2x128xf32>,
    %73 = vector.extract_strided_slice %68 {offsets = [4, 0], sizes = [2, 128], strides = [1, 1]} : vector<16x128xf32> to vector<2x128xf32>
    %c0_38 = arith.constant 0 : index
    %c256 = arith.constant 256 : index
    %74 = vector.load %arg5[%c0_38, %c256] : memref<2x1024xf32, #tpu.memory_space<vmem>>, vector<2x128xf32>
    tpu.vector_store %arg5[%c0_38, %c256], %73 {strides = array<i32>} : memref<2x1024xf32, #tpu.memory_space<vmem>>, vector<2x128xf32>,
    %75 = vector.extract_strided_slice %68 {offsets = [6, 0], sizes = [2, 128], strides = [1, 1]} : vector<16x128xf32> to vector<2x128xf32>
    %c0_39 = arith.constant 0 : index
    %c384 = arith.constant 384 : index
    %76 = vector.load %arg5[%c0_39, %c384] : memref<2x1024xf32, #tpu.memory_space<vmem>>, vector<2x128xf32>
    tpu.vector_store %arg5[%c0_39, %c384], %75 {strides = array<i32>} : memref<2x1024xf32, #tpu.memory_space<vmem>>, vector<2x128xf32>,
    %77 = vector.extract_strided_slice %68 {offsets = [8, 0], sizes = [2, 128], strides = [1, 1]} : vector<16x128xf32> to vector<2x128xf32>
    %c0_40 = arith.constant 0 : index
    %c512 = arith.constant 512 : index
    %78 = vector.load %arg5[%c0_40, %c512] : memref<2x1024xf32, #tpu.memory_space<vmem>>, vector<2x128xf32>
    tpu.vector_store %arg5[%c0_40, %c512], %77 {strides = array<i32>} : memref<2x1024xf32, #tpu.memory_space<vmem>>, vector<2x128xf32>,
    %79 = vector.extract_strided_slice %68 {offsets = [10, 0], sizes = [2, 128], strides = [1, 1]} : vector<16x128xf32> to vector<2x128xf32>
    %c0_41 = arith.constant 0 : index
    %c640 = arith.constant 640 : index
    %80 = vector.load %arg5[%c0_41, %c640] : memref<2x1024xf32, #tpu.memory_space<vmem>>, vector<2x128xf32>
    tpu.vector_store %arg5[%c0_41, %c640], %79 {strides = array<i32>} : memref<2x1024xf32, #tpu.memory_space<vmem>>, vector<2x128xf32>,
    %81 = vector.extract_strided_slice %68 {offsets = [12, 0], sizes = [2, 128], strides = [1, 1]} : vector<16x128xf32> to vector<2x128xf32>
    %c0_42 = arith.constant 0 : index
    %c768 = arith.constant 768 : index
    %82 = vector.load %arg5[%c0_42, %c768] : memref<2x1024xf32, #tpu.memory_space<vmem>>, vector<2x128xf32>
    tpu.vector_store %arg5[%c0_42, %c768], %81 {strides = array<i32>} : memref<2x1024xf32, #tpu.memory_space<vmem>>, vector<2x128xf32>,
    %83 = vector.extract_strided_slice %68 {offsets = [14, 0], sizes = [2, 128], strides = [1, 1]} : vector<16x128xf32> to vector<2x128xf32>
    %c0_43 = arith.constant 0 : index
    %c896 = arith.constant 896 : index
    %84 = vector.load %arg5[%c0_43, %c896] : memref<2x1024xf32, #tpu.memory_space<vmem>>, vector<2x128xf32>
    tpu.vector_store %arg5[%c0_43, %c896], %83 {strides = array<i32>} : memref<2x1024xf32, #tpu.memory_space<vmem>>, vector<2x128xf32>,
    %c0_44 = arith.constant 0 : index
    %c0_45 = arith.constant 0 : index
    %85 = vector.load %arg5[%c0_44, %c0_45] : memref<2x1024xf32, #tpu.memory_space<vmem>>, vector<2x1024xf32>
    %c0_46 = arith.constant 0 : index
    %c0_47 = arith.constant 0 : index
    %86 = vector.load %arg2[%c0_46, %c0_47] : memref<1024x64xf32, #tpu.memory_space<vmem>>, vector<1024x64xf32>
    %cst_48 = arith.constant dense<0.000000e+00> : vector<2x64xf32>
    %87 = tpu.matmul %85, %86, %cst_48 {dimension_numbers = #tpu.dot_dimension_numbers<[1], [0], [0], [1], [0, 0, 1, 1], [], []>} : vector<2x1024xf32>, vector<1024x64xf32>, vector<2x64xf32> -> vector<2x64xf32>
    %88 = vector.broadcast %6 : vector<1x64xf32> to vector<2x64xf32>
    %89 = arith.mulf %87, %88 : vector<2x64xf32>
    %90 = vector.broadcast %7 : vector<1x64xf32> to vector<2x64xf32>
    %91 = arith.addf %89, %90 : vector<2x64xf32>
    %cst_49 = arith.constant 0.000000e+00 : f32
    %92 = vector.broadcast %cst_49 : f32 to vector<2x64xf32>
    %93 = arith.maximumf %91, %92 : vector<2x64xf32>
    %c296 = arith.constant 296 : index
    %c0_50 = arith.constant 0 : index
    %94 = vector.load %arg3[%c296, %c0_50] : memref<664x128xf32, #tpu.memory_space<vmem>>, vector<64x32xf32>
    %cst_51 = arith.constant dense<0.000000e+00> : vector<2x32xf32>
    %95 = tpu.matmul %93, %94, %cst_51 {dimension_numbers = #tpu.dot_dimension_numbers<[1], [0], [0], [1], [0, 0, 1, 1], [], []>} : vector<2x64xf32>, vector<64x32xf32>, vector<2x32xf32> -> vector<2x32xf32>
    %96 = vector.broadcast %8 : vector<1x32xf32> to vector<2x32xf32>
    %97 = arith.mulf %95, %96 : vector<2x32xf32>
    %98 = vector.broadcast %9 : vector<1x32xf32> to vector<2x32xf32>
    %99 = arith.addf %97, %98 : vector<2x32xf32>
    %cst_52 = arith.constant 0.000000e+00 : f32
    %100 = vector.broadcast %cst_52 : f32 to vector<2x32xf32>
    %101 = arith.maximumf %99, %100 : vector<2x32xf32>
    %c360 = arith.constant 360 : index
    %c0_53 = arith.constant 0 : index
    %102 = vector.load %arg3[%c360, %c0_53] : memref<664x128xf32, #tpu.memory_space<vmem>>, vector<32x128xf32>
    %cst_54 = arith.constant dense<0.000000e+00> : vector<2x128xf32>
    %103 = tpu.matmul %101, %102, %cst_54 {dimension_numbers = #tpu.dot_dimension_numbers<[1], [0], [0], [1], [0, 0, 1, 1], [], []>} : vector<2x32xf32>, vector<32x128xf32>, vector<2x128xf32> -> vector<2x128xf32>
    %104 = vector.broadcast %10 : vector<1x128xf32> to vector<2x128xf32>
    %105 = arith.addf %103, %104 : vector<2x128xf32>
    %c0_55 = arith.constant 0 : index
    %c0_56 = arith.constant 0 : index
    %106 = vector.load %arg4[%c0_55, %c0_56] : memref<2x128xf32, #tpu.memory_space<vmem>>, vector<2x128xf32>
    tpu.vector_store %arg4[%c0_55, %c0_56], %105 {strides = array<i32>} : memref<2x128xf32, #tpu.memory_space<vmem>>, vector<2x128xf32>,
    return
  }
  func.func @transform_0(%arg0: i32) -> (i32, i32) {
    %c0_i32 = arith.constant 0 : i32
    %c0_i32_0 = arith.constant 0 : i32
    %c0_i32_1 = arith.constant 0 : i32
    return %c0_i32, %c0_i32_0 : i32, i32
  }
  func.func @transform_1(%arg0: i32) -> (i32, i32) {
    %c0_i32 = arith.constant 0 : i32
    %c0_i32_0 = arith.constant 0 : i32
    %c0_i32_1 = arith.constant 0 : i32
    return %c0_i32, %c0_i32_0 : i32, i32
  }
  func.func @transform_2(%arg0: i32) -> (i32, i32) {
    %c0_i32 = arith.constant 0 : i32
    %c0_i32_0 = arith.constant 0 : i32
    %c0_i32_1 = arith.constant 0 : i32
    return %c0_i32, %c0_i32_0 : i32, i32
  }
  func.func @transform_3(%arg0: i32) -> (i32, i32) {
    %c0_i32 = arith.constant 0 : i32
    %c0_i32_0 = arith.constant 0 : i32
    %c0_i32_1 = arith.constant 0 : i32
    return %c0_i32, %c0_i32_0 : i32, i32
  }
}

</mosaic_0001>

<bundles_post_ra>
// kernel: fingerprint_forward_pallas.1
= control target key start
LH: loop header
LB: loop body
LE: loop exit
PB: predicated region body
PF: predicated region fallthrough
CT: control target
= control target key end

     0   :  { %vm43_vm0 = vcmask 64512   ;;  %s4157_s0 = inlined_call_operand.vmem [shape: f32[128,8], index: 0, kind: input, shape index: {}]   ;;  %s4158_s1 = inlined_call_operand.vmem [shape: f32[1024,64], index: 1, kind: input, shape index: {}]   ;;  %s4159_s2 = inlined_call_operand.vmem [shape: f32[664,128], index: 2, kind: input, shape index: {}]   ;;  %s4160_s3 = inlined_call_operand.hbm [shape: f32[2,128], index: 3, kind: output, shape index: {}]  }
   0x1   :  { %v42_v0 = vld [vmem:[%s4159_s2] sm:$0xff]  ;;  %v27_v2 = vld [vmem:[%s4157_s0 + $0x8] sm:$0xff]  ;;  %v28_v3 = vld [vmem:[%s4157_s0 + $0x10] sm:$0xff] }
   0x2   :  { %v26_v1 = vld [vmem:[%s4157_s0] sm:$0xff]  ;;  %2637 = vmatprep.subr.mxu0 %v42_v0  ;;  %v29_v4 = vld [vmem:[%s4157_s0 + $0x18] sm:$0xff] }
   0x3   :  { %2639 = vmatprep.mubr.msk.f32.mxu0 %vm43_vm0, %v26_v1  ;;  %2638 = vmatpush3.msra.mxu0 %v42_v0  ;;  %v30_v5 = vld [vmem:[%s4157_s0 + $0x20] sm:$0xff] }
   0x4   :  { %2640 = vmatmul.mubr.msk.f32.vlgmr.msra.gmra.mrb[0].mxu0 %vm43_vm0, %v27_v2 }
   0x5   :  { %2642 = vmatprep.mubr.msk.f32.mxu0 %vm43_vm0, %v28_v3 }
   0x6   :  { %8 = vsyncpa [#allocation4], 0  ;;  %v31_v6 = vld [vmem:[%s4157_s0 + $0x28] sm:$0xff]  ;;  %v32_v7 = vld [vmem:[%s4157_s0 + $0x30] sm:$0xff]  ;;  %vm492_vm1 = vcmask 1045504   ;;  %vm510_vm2 = vcmask 261120  }
   0x7   :  { %v33_v8 = vld [vmem:[%s4157_s0 + $0x38] sm:$0xff]  ;;  %v34_v9 = vld [vmem:[%s4157_s0 + $0x40] sm:$0xff]  ;;  %v35_v10 = vld [vmem:[%s4157_s0 + $0x48] sm:$0xff]  ;;  %vm757_vm3 = vcmask 1043456   ;;  %vm946_vm4 = vcmask 523264   ;;  %vm3254_vm5 = vmmov 0  }
   0x8   :  { %2643 = vmatmul.mubr.msk.f32.gmra.mrb[2].mxu0 %vm43_vm0, %v29_v4  ;;  %v36_v11 = vld [vmem:[%s4157_s0 + $0x50] sm:$0xff]  ;;  %v37_v12 = vld [vmem:[%s4157_s0 + $0x58] sm:$0xff]  ;;  %v38_v13 = vld [vmem:[%s4157_s0 + $0x60] sm:$0xff]  ;;  %s3256_s7 = smov [#allocation3]  }
   0x9   :  { %2645 = vmatprep.mubr.msk.f32.mxu0 %vm43_vm0, %v30_v5  ;;  %v39_v14 = vld [vmem:[%s4157_s0 + $0x68] sm:$0xff]  ;;  %v40_v15 = vld [vmem:[%s4157_s0 + $0x70] sm:$0xff]  ;;  %v41_v16 = vld [vmem:[%s4157_s0 + $0x78] sm:$0xff]  ;;  %s2245_s8 = sshll.u32 %s3256_s7, 4  ;;  %s2246_s8 = int_to_ptr.vmem [resolvable:$true] %s2245_s8 }
   0xa   :  { %v293_v17 = vld [vmem:[%s4159_s2 + $0x198] sm:$0xff]  ;;  %v3350_v18 = vld [vmem:[%s4159_s2 + $0x188] ss:$0 sm:$0xff]  ;;  %v3355_v19 = vld [vmem:[%s4159_s2 + $0x189] ss:$0 sm:$0xff]  ;;  %s3228_s9 = scalar_lea.vmem %s2246_s8, 32  ;;  %p3233_p1 = scmp.lt.s32.totalorder %s2246_s8, %s2246_s8 }
   0xb   :  { %2695 = vmatprep.mubr.f32.mxu1 %v293_v17  ;;  %p3229_p0 = scmp.ne.s32.totalorder %s2246_s8, %s3228_s9  ;;  %p3234_p2 = scmp.lt.s32.totalorder %s3228_s9, %s3228_s9 }
   0xc   :  { %2646 = vmatmul.mubr.msk.f32.gmra.mrb[4].mxu0 %vm43_vm0, %v31_v6 }
   0xd   :  { %2648 = vmatprep.mubr.msk.f32.mxu0 %vm43_vm0, %v32_v7  ;;  %p3235_p3 = por %p3234_p2, %p3233_p1 }
   0xf   :  { %p3236_p4 = pnand %p3235_p3, %p3229_p0 }
  0x10   :  { %2649 = vmatmul.mubr.msk.f32.gmra.mrb[6].mxu0 %vm43_vm0, %v33_v8 }
  0x11   :  { %2651 = vmatprep.mubr.msk.f32.mxu0 %vm43_vm0, %v34_v9 }
  0x14   :  { %2652 = vmatmul.mubr.msk.f32.gmra.mrb[8].mxu0 %vm43_vm0, %v35_v10 }
  0x15   :  { %2654 = vmatprep.mubr.msk.f32.mxu0 %vm43_vm0, %v36_v11 }
  0x18   :  { %2655 = vmatmul.mubr.msk.f32.gmra.mrb[10].mxu0 %vm43_vm0, %v37_v12 }
  0x19   :  { %2657 = vmatprep.mubr.msk.f32.mxu0 %vm43_vm0, %v38_v13 }
  0x1c   :  { %2658 = vmatmul.mubr.msk.f32.gmra.mrb[12].mxu0 %vm43_vm0, %v39_v14 }
  0x1d   :  { %2660 = vmatprep.mubr.msk.f32.mxu0 %vm43_vm0, %v40_v15 }
  0x20   :  { %2661 = vmatmul.mubr.msk.f32.gmra.mrb[14].mxu0 %vm43_vm0, %v41_v16 }
  0xd7   :  { %v2641_v20 = vpop.f32.mrb[0].mxu0 }
  0xd8   :  { %v242_v21 = vmul.f32 %v2641_v20, %v3350_v18  ;;  %v158_v22 = vpop.f32.mrb[1].mxu0 }
  0xd9   :  { %v241_v23 = vmul.f32 %v3350_v18, %v158_v22 }
  0xda   :  { %v262_v24 = vadd.f32 %v3355_v19, %v242_v21 }
  0xdb   :  { %v261_v25 = vadd.f32 %v3355_v19, %v241_v23  ;;  %v2644_v26 = vpop.f32.mrb[2].mxu0 }
  0xdc   :  { %v278_v27 = vmax.f32 %v262_v24, 0.0  ;;  %v244_v28 = vmul.f32 %v2644_v26, %v3350_v18  ;;  %v168_v29 = vpop.f32.mrb[3].mxu0 }
  0xdd   :  { %v277_v30 = vmax.f32 %v261_v25, 0.0  ;;  %v243_v31 = vmul.f32 %v3350_v18, %v168_v29 }
  0xde   :  { %v264_v32 = vadd.f32 %v3355_v19, %v244_v28 }
  0xdf   :  { %v263_v33 = vadd.f32 %v3355_v19, %v243_v31  ;;  %v2647_v34 = vpop.f32.mrb[4].mxu0  ;;  %v2923_v35 = vpack.c.bf16 %v278_v27, %v277_v30  ;;  %v294_v30 = vld [vmem:[%s4159_s2 + $0x1a0] sm:$0xff]  ;;  %v297_v31 = vld [vmem:[%s4159_s2 + $0x1b8] sm:$0xff] }
  0xe0   :  { %v280_v36 = vmax.f32 %v264_v32, 0.0  ;;  %v246_v37 = vmul.f32 %v2647_v34, %v3350_v18  ;;  %v178_v38 = vpop.f32.mrb[5].mxu0  ;;  %v298_v32 = vld [vmem:[%s4159_s2 + $0x1c0] sm:$0xff]  ;;  %v300_v34 = vld [vmem:[%s4159_s2 + $0x1d0] sm:$0xff] }
  0xe1   :  { %v279_v39 = vmax.f32 %v263_v33, 0.0  ;;  %v245_v40 = vmul.f32 %v3350_v18, %v178_v38  ;;  %2924 = vmatprep.subr.bf16.mxu1 %v2923_v35  ;;  %v299_v33 = vld [vmem:[%s4159_s2 + $0x1c8] sm:$0xff]  ;;  %v304_v38 = vld [vmem:[%s4159_s2 + $0x1f0] sm:$0xff] }
  0xe2   :  { %v266_v41 = vadd.f32 %v3355_v19, %v246_v37  ;;  %2926 = vmatpush3.bf16.msra.mxu1 %v2923_v35  ;;  %v301_v35 = vld [vmem:[%s4159_s2 + $0x1d8] sm:$0xff]  ;;  %v303_v37 = vld [vmem:[%s4159_s2 + $0x1e8] sm:$0xff] }
  0xe3   :  { %v265_v42 = vadd.f32 %v3355_v19, %v245_v40  ;;  %v2650_v43 = vpop.f32.mrb[6].mxu0  ;;  %v2927_v44 = vpack.c.bf16 %v280_v36, %v279_v39  ;;  %v302_v36 = vld [vmem:[%s4159_s2 + $0x1e0] sm:$0xff]  ;;  %v305_v39 = vld [vmem:[%s4159_s2 + $0x1f8] sm:$0xff] }
  0xe4   :  { %v282_v45 = vmax.f32 %v266_v41, 0.0  ;;  %v248_v46 = vmul.f32 %v2650_v43, %v3350_v18  ;;  %v188_v47 = vpop.f32.mrb[7].mxu0  ;;  %v306_v40 = vld [vmem:[%s4159_s2 + $0x200] sm:$0xff]  ;;  %v307_v41 = vld [vmem:[%s4159_s2 + $0x208] sm:$0xff]  ;;  %v309_v43 = vld [vmem:[%s4159_s2 + $0x218] sm:$0xff] }
  0xe5   :  { %v281_v48 = vmax.f32 %v265_v42, 0.0  ;;  %v247_v49 = vmul.f32 %v3350_v18, %v188_v47  ;;  %2928 = vmatprep.subr.bf16.mxu1 %v2927_v44  ;;  %v308_v42 = vld [vmem:[%s4159_s2 + $0x210] sm:$0xff] }
  0xe6   :  { %v268_v50 = vadd.f32 %v3355_v19, %v248_v46  ;;  %2930 = vmatpush3.bf16.msra.mxu1 %v2927_v44  ;;  %v310_v44 = vld [vmem:[%s4159_s2 + $0x220] sm:$0xff]  ;;  %v480_v46 = vld [vmem:[%s4159_s2 + $0x30] sm:$0xff] }
  0xe7   :  { %v267_v51 = vadd.f32 %v3355_v19, %v247_v49  ;;  %v2653_v52 = vpop.f32.mrb[8].mxu0  ;;  %v2931_v53 = vpack.c.bf16 %v282_v45, %v281_v48  ;;  %v479_v45 = vld [vmem:[%s4159_s2 + $0x28] sm:$0xff]  ;;  %v481_v48 = vld [vmem:[%s4159_s2 + $0x38] sm:$0xff]  ;;  %v482_v49 = vld [vmem:[%s4159_s2 + $0x40] sm:$0xff] }
  0xe8   :  { %v284_v54 = vmax.f32 %v268_v50, 0.0  ;;  %v250_v55 = vmul.f32 %v2653_v52, %v3350_v18  ;;  %v198_v56 = vpop.f32.mrb[9].mxu0  ;;  %v2955_v47 = vpack.c.bf16 %v480_v46, %v479_v45  ;;  %v2959_v50 = vpack.c.bf16 %v482_v49, %v481_v48  ;;  %v476_v52 = vld [vmem:[%s4159_s2 + $0x10] sm:$0xff] }
  0xe9   :  { %v283_v57 = vmax.f32 %v267_v51, 0.0  ;;  %v249_v58 = vmul.f32 %v3350_v18, %v198_v56  ;;  %2932 = vmatprep.subr.bf16.mxu1 %v2931_v53  ;;  %v475_v51 = vld [vmem:[%s4159_s2 + $0x8] sm:$0xff] }
  0xea   :  { %v270_v59 = vadd.f32 %v3355_v19, %v250_v55  ;;  %2934 = vmatpush3.bf16.msra.mxu1 %v2931_v53  ;;  %2956 = vmatprep.subr.bf16.mxu0 %v2955_v47  ;;  %v2963_v53 = vpack.c.bf16 %v476_v52, %v475_v51 }
  0xeb   :  { %v269_v60 = vadd.f32 %v3355_v19, %v249_v58  ;;  %v2656_v61 = vpop.f32.mrb[10].mxu0  ;;  %v2935_v62 = vpack.c.bf16 %v284_v54, %v283_v57  ;;  %2958 = vmatpush3.bf16.msra.mxu0 %v2955_v47 }
  0xec   :  { %v286_v63 = vmax.f32 %v270_v59, 0.0  ;;  %v252_v0 = vmul.f32 %v2656_v61, %v3350_v18  ;;  %v208_v1 = vpop.f32.mrb[11].mxu0  ;;  %2960 = vmatprep.subr.bf16.mxu0 %v2959_v50 }
  0xed   :  { %v285_v2 = vmax.f32 %v269_v60, 0.0  ;;  %v251_v3 = vmul.f32 %v3350_v18, %v208_v1  ;;  %2936 = vmatprep.subr.bf16.mxu1 %v2935_v62 }
  0xee   :  { %v272_v4 = vadd.f32 %v3355_v19, %v252_v0  ;;  %2938 = vmatpush3.bf16.msra.mxu1 %v2935_v62 }
  0xef   :  { %v271_v5 = vadd.f32 %v3355_v19, %v251_v3  ;;  %v2659_v6 = vpop.f32.mrb[12].mxu0  ;;  %v2939_v7 = vpack.c.bf16 %v286_v63, %v285_v2  ;;  %2962 = vmatpush3.bf16.msra.mxu0 %v2959_v50 }
  0xf0   :  { %v288_v8 = vmax.f32 %v272_v4, 0.0  ;;  %v254_v9 = vmul.f32 %v2659_v6, %v3350_v18  ;;  %v218_v10 = vpop.f32.mrb[13].mxu0  ;;  %2964 = vmatprep.subr.bf16.mxu0 %v2963_v53  ;;  %v478_v6 = vld [vmem:[%s4159_s2 + $0x20] sm:$0xff] }
  0xf1   :  { %v287_v11 = vmax.f32 %v271_v5, 0.0  ;;  %v253_v12 = vmul.f32 %v3350_v18, %v218_v10  ;;  %2940 = vmatprep.subr.bf16.mxu1 %v2939_v7  ;;  %v477_v5 = vld [vmem:[%s4159_s2 + $0x18] sm:$0xff] }
  0xf2   :  { %v274_v13 = vadd.f32 %v3355_v19, %v254_v9  ;;  %2942 = vmatpush3.bf16.msra.mxu1 %v2939_v7 }
  0xf3   :  { %v273_v14 = vadd.f32 %v3355_v19, %v253_v12  ;;  %v2662_v15 = vpop.f32.mrb[14].mxu0  ;;  %v2943_v16 = vpack.c.bf16 %v288_v8, %v287_v11 }
  0xf4   :  { %v290_v17 = vmax.f32 %v274_v13, 0.0  ;;  %v256_v20 = vmul.f32 %v2662_v15, %v3350_v18  ;;  %v228_v21 = vpop.f32.mrb[15].mxu0 }
  0xf5   :  { %v289_v22 = vmax.f32 %v273_v14, 0.0  ;;  %v255_v23 = vmul.f32 %v3350_v18, %v228_v21  ;;  %2944 = vmatprep.subr.bf16.mxu1 %v2943_v16  ;;  %v295_v18 = vld [vmem:[%s4159_s2 + $0x1a8] sm:$0xff] }
  0xf6   :  { %v276_v24 = vadd.f32 %v3355_v19, %v256_v20  ;;  %2946 = vmatpush3.bf16.msra.mxu1 %v2943_v16  ;;  %v2967_v16 = vpack.c.bf16 %v478_v6, %v477_v5 }
  0xf7   :  { %v275_v25 = vadd.f32 %v3355_v19, %v255_v23  ;;  %v2947_v26 = vpack.c.bf16 %v290_v17, %v289_v22  ;;  %v296_v19 = vld [vmem:[%s4159_s2 + $0x1b0] sm:$0xff]  ;;  %v753_v22 = vld [vmem:[%s4159_s2 + $0x48] sm:$0xff] }
  0xf8   :  { %v292_v27 = vmax.f32 %v276_v24, 0.0  ;;  %v754_v23 = vld [vmem:[%s4159_s2 + $0x50] sm:$0xff] }
  0xf9   :  { %v291_v28 = vmax.f32 %v275_v25, 0.0  ;;  %2948 = vmatprep.subr.bf16.mxu1 %v2947_v26 }
  0xfa   :  { %2950 = vmatpush3.bf16.msra.mxu1 %v2947_v26 }
  0xfb   :  { %v2951_v29 = vpack.c.bf16 %v292_v27, %v291_v28 }
  0xfd   :  { %2952 = vmatprep.subr.bf16.mxu1 %v2951_v29 }
  0xfe   :  { %2954 = vmatpush3.bf16.msra.mxu1 %v2951_v29 }
 0x101   :  { %2696 = vmatmul.mubr.f32.vlgmr.msra.gmra.mrb[0].mxu1 %v294_v30 }
 0x102   :  { %2698 = vmatprep.mubr.f32.mxu1 %v295_v18 }
 0x105   :  { %2699 = vmatmul.mubr.f32.gmra.mrb[2].mxu1 %v296_v19 }
 0x106   :  { %2701 = vmatprep.mubr.f32.mxu1 %v297_v31  ;;  %v2971_v31 = vpack.c.bf16 %v754_v23, %v753_v22 }
 0x109   :  { %2702 = vmatmul.mubr.f32.gmra.mrb[4].mxu1 %v298_v32 }
 0x10a   :  { %2704 = vmatprep.mubr.f32.mxu1 %v299_v33 }
 0x10d   :  { %2705 = vmatmul.mubr.f32.gmra.mrb[6].mxu1 %v300_v34 }
 0x10e   :  { %2707 = vmatprep.mubr.f32.mxu1 %v301_v35 }
 0x111   :  { %2708 = vmatmul.mubr.f32.gmra.mrb[8].mxu1 %v302_v36 }
 0x112   :  { %2710 = vmatprep.mubr.f32.mxu1 %v303_v37 }
 0x115   :  { %2711 = vmatmul.mubr.f32.gmra.mrb[10].mxu1 %v304_v38 }
 0x116   :  { %2713 = vmatprep.mubr.f32.mxu1 %v305_v39 }
 0x119   :  { %2714 = vmatmul.mubr.f32.gmra.mrb[12].mxu1 %v306_v40 }
 0x11a   :  { %2716 = vmatprep.mubr.f32.mxu1 %v307_v41 }
 0x11d   :  { %2717 = vmatmul.mubr.f32.gmra.mrb[14].mxu1 %v308_v42 }
 0x11e   :  { %2719 = vmatprep.mubr.f32.mxu1 %v309_v43 }
 0x121   :  { %2720 = vmatmul.mubr.f32.gmra.mrb[16].mxu1 %v310_v44 }
 0x1d4   :  { %v2697_v54 = vpop.f32.mrb[0].mxu1 }
 0x1d5   :  { %v377_v55 = vpop.f32.mrb[1].mxu1 }
 0x1d8   :  { %v2700_v56 = vpop.f32.mrb[2].mxu1 }
 0x1d9   :  { %v387_v57 = vpop.f32.mrb[3].mxu1 }
 0x1dc   :  { %v2703_v58 = vpop.f32.mrb[4].mxu1 }
 0x1dd   :  { %v397_v59 = vpop.f32.mrb[5].mxu1 }
 0x1e0   :  { %v2706_v60 = vpop.f32.mrb[6].mxu1 }
 0x1e1   :  { %v407_v61 = vpop.f32.mrb[7].mxu1 }
 0x1e4   :  { %v2709_v62 = vpop.f32.mrb[8].mxu1 }
 0x1e5   :  { %v3458_v63 = vmax.f32 %v377_v55, %v2709_v62  ;;  %v417_v0 = vpop.f32.mrb[9].mxu1  ;;  %v1106_v62 = vld [vmem:[%s4159_s2 + $0xb0] sm:$0xff] }
 0x1e7   :  { %v493_v9 = vrot.slane %v3458_v63, 2  ;;  %v758_v10 = vrot.slane %v3458_v63, 4 }
 0x1e8   :  { %v2712_v1 = vpop.f32.mrb[10].mxu1 }
 0x1e9   :  { %v3460_v2 = vmax.f32 %v387_v57, %v2712_v1  ;;  %v427_v3 = vpop.f32.mrb[11].mxu1  ;;  %v755_v57 = vld [vmem:[%s4159_s2 + $0x58] sm:$0xff]  ;;  %v2296_v1 = vld [vmem:[%s4159_s2 + $0x18b] ss:$0 sm:$0xff] }
 0x1ea   :  { %v3462_v4 = vmax.f32 %v2697_v54, %v427_v3 }
 0x1eb   :  { %v496_v7 = vrot.slane %v3460_v2, 2  ;;  %v761_v8 = vrot.slane %v3460_v2, 4 }
 0x1ec   :  { %v494_v11 = vrot.slane %v3462_v4, 2  ;;  %v759_v12 = vrot.slane %v3462_v4, 4  ;;  %v2715_v13 = vpop.f32.mrb[12].mxu1 }
 0x1ed   :  { %v3476_v14 = vmax.f32 %v397_v59, %v2715_v13  ;;  %v437_v15 = vpop.f32.mrb[13].mxu1 }
 0x1ee   :  { %v469_v17 = vmax.f32 %v2700_v56, %v437_v15  ;;  %v495_v20 = vsel %vm492_vm1, %v493_v9, %v494_v11  ;;  %v497_v21 = vsel %vm492_vm1, %v494_v11, %v496_v7  ;;  %v760_v24 = vsel %vm757_vm3, %v758_v10, %v759_v12 }
 0x1ef   :  { %v500_v25 = vrot.slane %v3476_v14, 2  ;;  %v765_v26 = vrot.slane %v3476_v14, 4  ;;  %2730 = vmatprep.mubr.msk.f32.mxu0 %vm510_vm2, %v495_v20  ;;  %v762_v27 = vsel %vm757_vm3, %v759_v12, %v761_v8 }
 0x1f0   :  { %v498_v28 = vrot.slane %v469_v17, 2  ;;  %v763_v29 = vrot.slane %v469_v17, 4  ;;  %v2718_v30 = vpop.f32.mrb[14].mxu1  ;;  %2731 = vmatmul.mubr.msk.f32.vlgmr.msra.gmra.mrb[16].mxu0 %vm510_vm2, %v497_v21 }
 0x1f1   :  { %v472_v18 = vmax.f32 %v407_v61, %v2718_v30  ;;  %v447_v19 = vpop.f32.mrb[15].mxu1  ;;  %2966 = vmatpush3.bf16.msra.mxu0 %v2963_v53  ;;  %v1105_v61 = vld [vmem:[%s4159_s2 + $0xa8] sm:$0xff] }
 0x1f2   :  { %v471_v32 = vmax.f32 %v2703_v58, %v447_v19  ;;  %v499_v33 = vsel %vm492_vm1, %v496_v7, %v498_v28  ;;  %v501_v34 = vsel %vm492_vm1, %v498_v28, %v500_v25  ;;  %2968 = vmatprep.subr.bf16.mxu0 %v2967_v16  ;;  %v764_v35 = vsel %vm757_vm3, %v761_v8, %v763_v29  ;;  %v756_v58 = vld [vmem:[%s4159_s2 + $0x60] sm:$0xff] }
 0x1f3   :  { %v504_v36 = vrot.slane %v472_v18, 2  ;;  %v769_v37 = vrot.slane %v472_v18, 4  ;;  %2733 = vmatprep.mubr.msk.f32.mxu0 %vm510_vm2, %v499_v33  ;;  %v766_v38 = vsel %vm757_vm3, %v763_v29, %v765_v26  ;;  %v2975_v59 = vpack.c.bf16 %v756_v58, %v755_v57  ;;  %v1098_v57 = vld [vmem:[%s4159_s2 + $0x70] sm:$0xff] }
 0x1f4   :  { %v502_v39 = vrot.slane %v471_v32, 2  ;;  %v767_v40 = vrot.slane %v471_v32, 4  ;;  %v2721_v41 = vpop.f32.mrb[16].mxu1  ;;  %2734 = vmatmul.mubr.msk.f32.gmra.mrb[18].mxu0 %vm510_vm2, %v501_v34 }
 0x1f5   :  { %v474_v42 = vmax.f32 %v417_v0, %v2721_v41  ;;  %v457_v43 = vpop.f32.mrb[17].mxu1  ;;  %2970 = vmatpush3.bf16.msra.mxu0 %v2967_v16  ;;  %v2295_v0 = vld [vmem:[%s4159_s2 + $0x18a] ss:$0 sm:$0xff] }
 0x1f6   :  { %v473_v44 = vmax.f32 %v2706_v60, %v457_v43  ;;  %v503_v45 = vsel %vm492_vm1, %v500_v25, %v502_v39  ;;  %v505_v46 = vsel %vm492_vm1, %v502_v39, %v504_v36  ;;  %2972 = vmatprep.subr.bf16.mxu0 %v2971_v31  ;;  %v768_v47 = vsel %vm757_vm3, %v765_v26, %v767_v40  ;;  %v936_v60 = vld [vmem:[%s4159_s2 + $0x228] sm:$0xff]  ;;  %v938_v39 = vld [vmem:[%s4159_s2 + $0x238] sm:$0xff] }
 0x1f7   :  { %v508_v48 = vrot.slane %v474_v42, 2  ;;  %v773_v49 = vrot.slane %v474_v42, 4  ;;  %2736 = vmatprep.mubr.msk.f32.mxu0 %vm510_vm2, %v503_v45  ;;  %v770_v50 = vsel %vm757_vm3, %v767_v40, %v769_v37  ;;  %2798 = vmatprep.mubr.msk.f32.mxu1 %vm946_vm4, %v936_v60  ;;  %v939_v40 = vld [vmem:[%s4159_s2 + $0x240] sm:$0xff]  ;;  %v940_v41 = vld [vmem:[%s4159_s2 + $0x248] sm:$0xff]  ;;  %v941_v42 = vld [vmem:[%s4159_s2 + $0x250] sm:$0xff] }
 0x1f8   :  { %v506_v51 = vrot.slane %v473_v44, 2  ;;  %v771_v52 = vrot.slane %v473_v44, 4  ;;  %2737 = vmatmul.mubr.msk.f32.gmra.mrb[20].mxu0 %vm510_vm2, %v505_v46  ;;  %v942_v43 = vld [vmem:[%s4159_s2 + $0x258] sm:$0xff]  ;;  %v944_v45 = vld [vmem:[%s4159_s2 + $0x268] sm:$0xff]  ;;  %v945_v46 = vld [vmem:[%s4159_s2 + $0x270] sm:$0xff] }
 0x1fa   :  { %v507_v53 = vsel %vm492_vm1, %v504_v36, %v506_v51  ;;  %v509_v54 = vsel %vm492_vm1, %v506_v51, %v508_v48  ;;  %v772_v55 = vsel %vm757_vm3, %v769_v37, %v771_v52  ;;  %v774_v56 = vsel %vm757_vm3, %v771_v52, %v773_v49  ;;  %v1108_v48 = vld [vmem:[%s4159_s2 + $0xc0] sm:$0xff]  ;;  %v1110_v51 = vld [vmem:[%s4159_s2 + $0xd0] sm:$0xff] }
 0x1fb   :  { %2739 = vmatprep.mubr.msk.f32.mxu0 %vm510_vm2, %v507_v53  ;;  %v1111_v53 = vld [vmem:[%s4159_s2 + $0xd8] sm:$0xff] }
 0x1fc   :  { %2740 = vmatmul.mubr.msk.f32.gmra.mrb[22].mxu0 %vm510_vm2, %v509_v54  ;;  %v1112_v54 = vld [vmem:[%s4159_s2 + $0xe0] sm:$0xff] }
 0x1fd   :  { %2750 = vmatprep.mubr.msk.f32.mxu0 %vm510_vm2, %v3458_v63  ;;  %v2995_v63 = vpack.c.bf16 %v1106_v62, %v1105_v61 }
 0x200   :  { %2751 = vmatmul.mubr.msk.f32.vlgmr.msra.gmra.mrb[16].mxu0 %vm510_vm2, %v3462_v4 }
 0x201   :  { %2753 = vmatprep.mubr.msk.f32.mxu0 %vm510_vm2, %v3460_v2  ;;  %2974 = vmatpush3.bf16.msra.mxu0 %v2971_v31 }
 0x202   :  { %2976 = vmatprep.subr.bf16.mxu0 %v2975_v59 }
 0x204   :  { %2754 = vmatmul.mubr.msk.f32.gmra.mrb[18].mxu0 %vm510_vm2, %v469_v17 }
 0x205   :  { %2756 = vmatprep.mubr.msk.f32.mxu0 %vm510_vm2, %v3476_v14  ;;  %2978 = vmatpush3.bf16.msra.mxu0 %v2975_v59 }
 0x206   :  { %2996 = vmatprep.subr.bf16.mxu0 %v2995_v63 }
 0x208   :  { %2757 = vmatmul.mubr.msk.f32.gmra.mrb[20].mxu0 %vm510_vm2, %v471_v32 }
 0x209   :  { %2759 = vmatprep.mubr.msk.f32.mxu0 %vm510_vm2, %v472_v18 }
 0x20c   :  { %2760 = vmatmul.mubr.msk.f32.gmra.mrb[22].mxu0 %vm510_vm2, %v473_v44  ;;  %v943_v44 = vld [vmem:[%s4159_s2 + $0x260] sm:$0xff] }
 0x20d   :  { %2770 = vmatprep.mubr.msk.f32.mxu0 %vm510_vm2, %v760_v24 }
 0x210   :  { %2771 = vmatmul.mubr.msk.f32.vlgmr.msra.gmra.mrb[16].mxu0 %vm510_vm2, %v762_v27 }
 0x211   :  { %2773 = vmatprep.mubr.msk.f32.mxu0 %vm510_vm2, %v764_v35  ;;  %2998 = vmatpush3.bf16.msra.mxu0 %v2995_v63 }
 0x214   :  { %2774 = vmatmul.mubr.msk.f32.gmra.mrb[18].mxu0 %vm510_vm2, %v766_v38  ;;  %v937_v38 = vld [vmem:[%s4159_s2 + $0x230] sm:$0xff] }
 0x215   :  { %2776 = vmatprep.mubr.msk.f32.mxu0 %vm510_vm2, %v768_v47  ;;  %v1107_v47 = vld [vmem:[%s4159_s2 + $0xb8] sm:$0xff] }
 0x216   :  { %v2999_v49 = vpack.c.bf16 %v1108_v48, %v1107_v47  ;;  %v1320_v47 = vld [vmem:[%s4159_s2 + $0x120] sm:$0xff] }
 0x218   :  { %2777 = vmatmul.mubr.msk.f32.gmra.mrb[20].mxu0 %vm510_vm2, %v770_v50  ;;  %3000 = vmatprep.subr.bf16.mxu0 %v2999_v49  ;;  %v1109_v50 = vld [vmem:[%s4159_s2 + $0xc8] sm:$0xff] }
 0x219   :  { %2779 = vmatprep.mubr.msk.f32.mxu0 %vm510_vm2, %v772_v55  ;;  %3002 = vmatpush3.bf16.msra.mxu0 %v2999_v49  ;;  %v3003_v52 = vpack.c.bf16 %v1110_v51, %v1109_v50  ;;  %v3007_v55 = vpack.c.bf16 %v1112_v54, %v1111_v53  ;;  %v1447_v49 = vld [vmem:[%s4159_s2 + $0x278] sm:$0xff]  ;;  %v1650_v50 = vld [vmem:[%s4158_s1 + $0x180] sm:$0xff]  ;;  %v1651_v51 = vld [vmem:[%s4158_s1 + $0x188] sm:$0xff] }
 0x21a   :  { %v1634_v53 = vld [vmem:[%s4158_s1 + $0x100] sm:$0xff]  ;;  %v1635_v54 = vld [vmem:[%s4158_s1 + $0x108] sm:$0xff] }
 0x21b   :  { %3004 = vmatprep.subr.bf16.mxu0 %v3003_v52 }
 0x21c   :  { %2780 = vmatmul.mubr.msk.f32.gmra.mrb[22].mxu0 %vm510_vm2, %v774_v56  ;;  %v1097_v56 = vld [vmem:[%s4159_s2 + $0x68] sm:$0xff] }
 0x21d   :  { %3006 = vmatpush3.bf16.msra.mxu0 %v3003_v52  ;;  %v3011_v58 = vpack.c.bf16 %v1098_v57, %v1097_v56  ;;  %v3083_v52 = vpack.c.bf16 %v1651_v51, %v1650_v50  ;;  %v1652_v56 = vld [vmem:[%s4158_s1 + $0x190] sm:$0xff]  ;;  %v1653_v57 = vld [vmem:[%s4158_s1 + $0x198] sm:$0xff] }
 0x21e   :  { %3008 = vmatprep.subr.bf16.mxu0 %v3007_v55  ;;  %v1656_v51 = vld [vmem:[%s4158_s1 + $0x1b0] sm:$0xff] }
 0x221   :  { %3010 = vmatpush3.bf16.msra.mxu0 %v3007_v55  ;;  %v3085_v55 = vpack.c.bf16 %v1635_v54, %v1634_v53  ;;  %v1640_v54 = vld [vmem:[%s4158_s1 + $0x130] sm:$0xff] }
 0x222   :  { %3012 = vmatprep.subr.bf16.mxu0 %v3011_v58 }
 0x2e3   :  { %v2772_v2 = vpop.f32.mrb[16].mxu0 }
 0x2e4   :  { %v909_v3 = vmul.f32 %v2772_v2, %v2295_v0  ;;  %v857_v4 = vpop.f32.mrb[17].mxu0 }
 0x2e5   :  { %v908_v5 = vmul.f32 %v2295_v0, %v857_v4 }
 0x2e6   :  { %v921_v6 = vadd.f32 %v2296_v1, %v909_v3 }
 0x2e7   :  { %v920_v7 = vadd.f32 %v2296_v1, %v908_v5  ;;  %v2775_v8 = vpop.f32.mrb[18].mxu0 }
 0x2e8   :  { %v929_v9 = vmax.f32 %v921_v6, 0.0  ;;  %v911_v10 = vmul.f32 %v2775_v8, %v2295_v0  ;;  %v867_v11 = vpop.f32.mrb[19].mxu0  ;;  %v1099_v6 = vld [vmem:[%s4159_s2 + $0x78] sm:$0xff] }
 0x2e9   :  { %v928_v12 = vmax.f32 %v920_v7, 0.0  ;;  %v910_v13 = vmul.f32 %v2295_v0, %v867_v11  ;;  %v1100_v7 = vld [vmem:[%s4159_s2 + $0x80] sm:$0xff] }
 0x2ea   :  { %v923_v14 = vadd.f32 %v2296_v1, %v911_v10 }
 0x2eb   :  { %v922_v15 = vadd.f32 %v2296_v1, %v910_v13  ;;  %v2778_v16 = vpop.f32.mrb[20].mxu0  ;;  %v2979_v17 = vpack.c.bf16 %v929_v9, %v928_v12 }
 0x2ec   :  { %v931_v20 = vmax.f32 %v923_v14, 0.0  ;;  %v913_v21 = vmul.f32 %v2778_v16, %v2295_v0  ;;  %v877_v22 = vpop.f32.mrb[21].mxu0 }
 0x2ed   :  { %v930_v23 = vmax.f32 %v922_v15, 0.0  ;;  %v912_v24 = vmul.f32 %v2295_v0, %v877_v22  ;;  %2980 = vmatprep.subr.bf16.mxu1 %v2979_v17 }
 0x2ee   :  { %v925_v25 = vadd.f32 %v2296_v1, %v913_v21  ;;  %2982 = vmatpush3.bf16.msra.mxu1 %v2979_v17  ;;  %v3015_v17 = vpack.c.bf16 %v1100_v7, %v1099_v6 }
 0x2ef   :  { %v924_v26 = vadd.f32 %v2296_v1, %v912_v24  ;;  %v2781_v27 = vpop.f32.mrb[22].mxu0  ;;  %v2983_v28 = vpack.c.bf16 %v931_v20, %v930_v23  ;;  %v1101_v23 = vld [vmem:[%s4159_s2 + $0x88] sm:$0xff]  ;;  %v1102_v24 = vld [vmem:[%s4159_s2 + $0x90] sm:$0xff] }
 0x2f0   :  { %v933_v29 = vmax.f32 %v925_v25, 0.0  ;;  %v915_v30 = vmul.f32 %v2781_v27, %v2295_v0  ;;  %v887_v18 = vpop.f32.mrb[23].mxu0 }
 0x2f1   :  { %v932_v19 = vmax.f32 %v924_v26, 0.0  ;;  %v914_v31 = vmul.f32 %v2295_v0, %v887_v18  ;;  %2984 = vmatprep.subr.bf16.mxu1 %v2983_v28  ;;  %v3019_v18 = vpack.c.bf16 %v1102_v24, %v1101_v23  ;;  %v1602_v23 = vld [vmem:[%s4158_s1] sm:$0xff]  ;;  %v1603_v24 = vld [vmem:[%s4158_s1 + $0x8] sm:$0xff] }
 0x2f2   :  { %v927_v32 = vadd.f32 %v2296_v1, %v915_v30  ;;  %2986 = vmatpush3.bf16.msra.mxu1 %v2983_v28 }
 0x2f3   :  { %v926_v33 = vadd.f32 %v2296_v1, %v914_v31  ;;  %v2987_v34 = vpack.c.bf16 %v933_v29, %v932_v19 }
 0x2f4   :  { %v935_v35 = vmax.f32 %v927_v32, 0.0 }
 0x2f5   :  { %v934_v36 = vmax.f32 %v926_v33, 0.0  ;;  %2988 = vmatprep.subr.bf16.mxu1 %v2987_v34 }
 0x2f6   :  { %2990 = vmatpush3.bf16.msra.mxu1 %v2987_v34  ;;  %v1103_v34 = vld [vmem:[%s4159_s2 + $0x98] sm:$0xff] }
 0x2f7   :  { %v2991_v37 = vpack.c.bf16 %v935_v35, %v934_v36  ;;  %v1104_v35 = vld [vmem:[%s4159_s2 + $0xa0] sm:$0xff] }
 0x2f8   :  { %v3023_v36 = vpack.c.bf16 %v1104_v35, %v1103_v34  ;;  %v1623_v34 = vld [vmem:[%s4158_s1 + $0xa8] sm:$0xff] }
 0x2f9   :  { %2992 = vmatprep.subr.bf16.mxu1 %v2991_v37 }
 0x2fa   :  { %2994 = vmatpush3.bf16.msra.mxu1 %v2991_v37  ;;  %v1313_v37 = vld [vmem:[%s4159_s2 + $0xe8] sm:$0xff] }
 0x2fd   :  { %2799 = vmatmul.mubr.msk.f32.vlgmr.msra.gmra.mrb[18].mxu1 %vm946_vm4, %v937_v38  ;;  %v1314_v38 = vld [vmem:[%s4159_s2 + $0xf0] sm:$0xff] }
 0x2fe   :  { %2801 = vmatprep.mubr.msk.f32.mxu1 %vm946_vm4, %v938_v39  ;;  %v3027_v39 = vpack.c.bf16 %v1314_v38, %v1313_v37  ;;  %v1607_v37 = vld [vmem:[%s4158_s1 + $0x28] sm:$0xff] }
 0x301   :  { %2802 = vmatmul.mubr.msk.f32.gmra.mrb[20].mxu1 %vm946_vm4, %v939_v40  ;;  %v1315_v40 = vld [vmem:[%s4159_s2 + $0xf8] sm:$0xff] }
 0x302   :  { %2804 = vmatprep.mubr.msk.f32.mxu1 %vm946_vm4, %v940_v41  ;;  %v1316_v41 = vld [vmem:[%s4159_s2 + $0x100] sm:$0xff] }
 0x305   :  { %2805 = vmatmul.mubr.msk.f32.gmra.mrb[22].mxu1 %vm946_vm4, %v941_v42  ;;  %v3031_v42 = vpack.c.bf16 %v1316_v41, %v1315_v40  ;;  %v1655_v40 = vld [vmem:[%s4158_s1 + $0x1a8] sm:$0xff] }
 0x306   :  { %2807 = vmatprep.mubr.msk.f32.mxu1 %vm946_vm4, %v942_v43  ;;  %v1317_v43 = vld [vmem:[%s4159_s2 + $0x108] sm:$0xff] }
 0x309   :  { %2808 = vmatmul.mubr.msk.f32.gmra.mrb[24].mxu1 %vm946_vm4, %v943_v44  ;;  %v1318_v44 = vld [vmem:[%s4159_s2 + $0x110] sm:$0xff] }
 0x30a   :  { %2810 = vmatprep.mubr.msk.f32.mxu1 %vm946_vm4, %v944_v45  ;;  %v3035_v45 = vpack.c.bf16 %v1318_v44, %v1317_v43  ;;  %v1639_v43 = vld [vmem:[%s4158_s1 + $0x128] sm:$0xff] }
 0x30d   :  { %2811 = vmatmul.mubr.msk.f32.gmra.mrb[26].mxu1 %vm946_vm4, %v945_v46  ;;  %v1319_v46 = vld [vmem:[%s4159_s2 + $0x118] sm:$0xff] }
 0x30e   :  { %v3039_v48 = vpack.c.bf16 %v1320_v47, %v1319_v46  ;;  %2887 = vmatprep.mubr.msk.f32.mxu1 %vm510_vm2, %v1447_v49  ;;  %v1625_v46 = vld [vmem:[%s4158_s1 + $0xb8] sm:$0xff] }
 0x30f   :  { %v1609_v49 = vld [vmem:[%s4158_s1 + $0x38] sm:$0xff] }
 0x3d0   :  { %v2800_v59 = vpop.f32.mrb[18].mxu1 }
 0x3d1   :  { %v1043_v60 = vpop.f32.mrb[19].mxu1 }
 0x3d4   :  { %v2803_v61 = vpop.f32.mrb[20].mxu1 }
 0x3d5   :  { %v1053_v62 = vpop.f32.mrb[21].mxu1 }
 0x3d8   :  { %v2806_v63 = vpop.f32.mrb[22].mxu1 }
 0x3d9   :  { %v1092_v0 = vmax.f32 %v1043_v60, %v2806_v63  ;;  %v1063_v1 = vpop.f32.mrb[23].mxu1  ;;  %v1637_v60 = vld [vmem:[%s4158_s1 + $0x118] sm:$0xff]  ;;  %v2320_v63 = vld [vmem:[%s4159_s2 + $0x18d] ss:$0 sm:$0xff] }
 0x3db   :  { %v1118_v10 = vrot.slane %v1092_v0, 2  ;;  %v1321_v11 = vrot.slane %v1092_v0, 4 }
 0x3dc   :  { %v2809_v2 = vpop.f32.mrb[24].mxu1 }
 0x3dd   :  { %v1094_v3 = vmax.f32 %v1053_v62, %v2809_v2  ;;  %v1073_v4 = vpop.f32.mrb[25].mxu1  ;;  %v2319_v62 = vld [vmem:[%s4159_s2 + $0x18c] ss:$0 sm:$0xff] }
 0x3de   :  { %v1093_v5 = vmax.f32 %v2800_v59, %v1073_v4  ;;  %v3087_v59 = vpack.c.bf16 %v1653_v57, %v1652_v56  ;;  %v1626_v57 = vld [vmem:[%s4158_s1 + $0xc0] sm:$0xff] }
 0x3df   :  { %v1121_v8 = vrot.slane %v1094_v3, 2  ;;  %v1324_v9 = vrot.slane %v1094_v3, 4 }
 0x3e0   :  { %v1119_v12 = vrot.slane %v1093_v5, 2  ;;  %v1322_v13 = vrot.slane %v1093_v5, 4  ;;  %v2812_v14 = vpop.f32.mrb[26].mxu1 }
 0x3e1   :  { %v1096_v15 = vmax.f32 %v1063_v1, %v2812_v14  ;;  %v1083_v16 = vpop.f32.mrb[27].mxu1 }
 0x3e2   :  { %v1095_v20 = vmax.f32 %v2803_v61, %v1083_v16  ;;  %v1120_v21 = vsel %vm492_vm1, %v1118_v10, %v1119_v12  ;;  %v1122_v22 = vsel %vm492_vm1, %v1119_v12, %v1121_v8  ;;  %v1323_v25 = vsel %vm757_vm3, %v1321_v11, %v1322_v13  ;;  %v1618_v16 = vld [vmem:[%s4158_s1 + $0x80] sm:$0xff] }
 0x3e3   :  { %v1125_v26 = vrot.slane %v1096_v15, 2  ;;  %v1328_v27 = vrot.slane %v1096_v15, 4  ;;  %2829 = vmatprep.mubr.msk.f32.mxu0 %vm946_vm4, %v1120_v21  ;;  %v1325_v28 = vsel %vm757_vm3, %v1322_v13, %v1324_v9 }
 0x3e4   :  { %v1123_v29 = vrot.slane %v1095_v20, 2  ;;  %v1326_v30 = vrot.slane %v1095_v20, 4  ;;  %2830 = vmatmul.mubr.msk.f32.vlgmr.msra.gmra.mrb[24].mxu0 %vm946_vm4, %v1122_v22 }
 0x3e5   :  { %3014 = vmatpush3.bf16.msra.mxu0 %v3011_v58  ;;  %v1636_v58 = vld [vmem:[%s4158_s1 + $0x110] sm:$0xff] }
 0x3e6   :  { %v1124_v19 = vsel %vm492_vm1, %v1121_v8, %v1123_v29  ;;  %3016 = vmatprep.subr.bf16.mxu0 %v3015_v17  ;;  %v1126_v31 = vsel %vm492_vm1, %v1123_v29, %v1125_v26  ;;  %v1327_v32 = vsel %vm757_vm3, %v1324_v9, %v1326_v30  ;;  %v1329_v33 = vsel %vm757_vm3, %v1326_v30, %v1328_v27  ;;  %v1621_v26 = vld [vmem:[%s4158_s1 + $0x98] sm:$0xff]  ;;  %v1448_v27 = vld [vmem:[%s4159_s2 + $0x280] sm:$0xff]  ;;  %v1449_v29 = vld [vmem:[%s4159_s2 + $0x288] sm:$0xff] }
 0x3e7   :  { %2832 = vmatprep.mubr.msk.f32.mxu0 %vm946_vm4, %v1124_v19  ;;  %v3089_v61 = vpack.c.bf16 %v1637_v60, %v1636_v58  ;;  %v1605_v19 = vld [vmem:[%s4158_s1 + $0x18] sm:$0xff]  ;;  %v1627_v58 = vld [vmem:[%s4158_s1 + $0xc8] sm:$0xff]  ;;  %v1610_v60 = vld [vmem:[%s4158_s1 + $0x40] sm:$0xff] }
 0x3e8   :  { %2833 = vmatmul.mubr.msk.f32.gmra.mrb[26].mxu0 %vm946_vm4, %v1126_v31  ;;  %v1450_v31 = vld [vmem:[%s4159_s2 + $0x290] sm:$0xff] }
 0x3e9   :  { %3018 = vmatpush3.bf16.msra.mxu0 %v3015_v17  ;;  %2851 = vmatprep.mubr.msk.f32.mxu0 %vm946_vm4, %v1092_v0  ;;  %v1619_v17 = vld [vmem:[%s4158_s1 + $0x88] sm:$0xff] }
 0x3ea   :  { %3020 = vmatprep.subr.bf16.mxu0 %v3019_v18  ;;  %v3051_v22 = vpack.c.bf16 %v1619_v17, %v1618_v16  ;;  %v1630_v16 = vld [vmem:[%s4158_s1 + $0xe0] sm:$0xff] }
 0x3ed   :  { %3022 = vmatpush3.bf16.msra.mxu0 %v3019_v18  ;;  %v1604_v18 = vld [vmem:[%s4158_s1 + $0x10] sm:$0xff] }
 0x3ee   :  { %3024 = vmatprep.subr.bf16.mxu0 %v3023_v36 }
 0x3f1   :  { %3026 = vmatpush3.bf16.msra.mxu0 %v3023_v36  ;;  %v1606_v36 = vld [vmem:[%s4158_s1 + $0x20] sm:$0xff] }
 0x3f2   :  { %3028 = vmatprep.subr.bf16.mxu0 %v3027_v39  ;;  %v3061_v38 = vpack.c.bf16 %v1607_v37, %v1606_v36  ;;  %v1665_v36 = vld [vmem:[%s4158_s1 + $0x1f8] sm:$0xff]  ;;  %v1648_v37 = vld [vmem:[%s4158_s1 + $0x170] sm:$0xff] }
 0x3f4   :  { %2852 = vmatmul.mubr.msk.f32.vlgmr.msra.gmra.mrb[24].mxu0 %vm946_vm4, %v1093_v5 }
 0x3f5   :  { %2854 = vmatprep.mubr.msk.f32.mxu0 %vm946_vm4, %v1094_v3  ;;  %3030 = vmatpush3.bf16.msra.mxu0 %v3027_v39  ;;  %v1654_v39 = vld [vmem:[%s4158_s1 + $0x1a0] sm:$0xff] }
 0x3f6   :  { %3032 = vmatprep.subr.bf16.mxu0 %v3031_v42  ;;  %v3091_v41 = vpack.c.bf16 %v1655_v40, %v1654_v39 }
 0x3f8   :  { %2855 = vmatmul.mubr.msk.f32.gmra.mrb[26].mxu0 %vm946_vm4, %v1095_v20 }
 0x3f9   :  { %3034 = vmatpush3.bf16.msra.mxu0 %v3031_v42  ;;  %2873 = vmatprep.mubr.msk.f32.mxu0 %vm946_vm4, %v1323_v25  ;;  %v1620_v25 = vld [vmem:[%s4158_s1 + $0x90] sm:$0xff]  ;;  %v1638_v42 = vld [vmem:[%s4158_s1 + $0x120] sm:$0xff] }
 0x3fa   :  { %3036 = vmatprep.subr.bf16.mxu0 %v3035_v45  ;;  %v3055_v30 = vpack.c.bf16 %v1621_v26, %v1620_v25  ;;  %v3093_v44 = vpack.c.bf16 %v1639_v43, %v1638_v42  ;;  %v1662_v25 = vld [vmem:[%s4158_s1 + $0x1e0] sm:$0xff]  ;;  %v1663_v26 = vld [vmem:[%s4158_s1 + $0x1e8] sm:$0xff] }
 0x3fb   :  { %v1683_v42 = vld [vmem:[%s4158_s1 + $0x288] sm:$0xff] }
 0x3fd   :  { %3038 = vmatpush3.bf16.msra.mxu0 %v3035_v45  ;;  %v1624_v45 = vld [vmem:[%s4158_s1 + $0xb0] sm:$0xff] }
 0x3fe   :  { %3040 = vmatprep.subr.bf16.mxu0 %v3039_v48  ;;  %v3063_v47 = vpack.c.bf16 %v1625_v46, %v1624_v45  ;;  %v1715_v45 = vld [vmem:[%s4158_s1 + $0x388] sm:$0xff] }
 0x401   :  { %3042 = vmatpush3.bf16.msra.mxu0 %v3039_v48  ;;  %v1608_v48 = vld [vmem:[%s4158_s1 + $0x30] sm:$0xff] }
 0x402   :  { %3084 = vmatprep.subr.bf16.mxu0 %v3083_v52  ;;  %v3065_v50 = vpack.c.bf16 %v1609_v49, %v1608_v48  ;;  %v1657_v52 = vld [vmem:[%s4158_s1 + $0x1b8] sm:$0xff]  ;;  %v1555_v49 = vlaneseq }
 0x403   :  { %v3095_v53 = vpack.c.bf16 %v1657_v52, %v1656_v51 }
 0x404   :  { %2874 = vmatmul.mubr.msk.f32.vlgmr.msra.gmra.mrb[24].mxu0 %vm946_vm4, %v1325_v28  ;;  %v3053_v28 = vpack.c.bf16 %v1603_v24, %v1602_v23  ;;  %v1556_v51 = vshrl.u32 %v1555_v49, 7  ;;  %v1721_v49 = vld [vmem:[%s4158_s1 + $0x3b8] sm:$0xff] }
 0x405   :  { %2876 = vmatprep.mubr.msk.f32.mxu0 %vm946_vm4, %v1327_v32  ;;  %3086 = vmatpush3.bf16.msra.mxu0 %v3085_v55  ;;  %v3057_v32 = vpack.c.bf16 %v1605_v19, %v1604_v18  ;;  %v1641_v55 = vld [vmem:[%s4158_s1 + $0x138] sm:$0xff] }
 0x406   :  { %3088 = vmatprep.subr.bf16.mxu0 %v3087_v59  ;;  %v3097_v56 = vpack.c.bf16 %v1641_v55, %v1640_v54  ;;  %v3067_v59 = vpack.c.bf16 %v1627_v58, %v1626_v57  ;;  %v1633_v18 = vld [vmem:[%s4158_s1 + $0xf8] sm:$0xff] }
 0x408   :  { %2877 = vmatmul.mubr.msk.f32.gmra.mrb[26].mxu0 %vm946_vm4, %v1329_v33  ;;  %v1622_v33 = vld [vmem:[%s4158_s1 + $0xa0] sm:$0xff] }
 0x409   :  { %3090 = vmatpush3.bf16.msra.mxu0 %v3089_v61  ;;  %v3059_v35 = vpack.c.bf16 %v1623_v34, %v1622_v33  ;;  %v1611_v61 = vld [vmem:[%s4158_s1 + $0x48] sm:$0xff]  ;;  %v1617_v33 = vld [vmem:[%s4158_s1 + $0x78] sm:$0xff]  ;;  %v1664_v34 = vld [vmem:[%s4158_s1 + $0x1f0] sm:$0xff] }
 0x40a   :  { %3092 = vmatprep.subr.bf16.mxu0 %v3091_v41  ;;  %v3111_v39 = vpack.c.bf16 %v1665_v36, %v1664_v34  ;;  %v1682_v41 = vld [vmem:[%s4158_s1 + $0x280] sm:$0xff]  ;;  %v1719_v36 = vld [vmem:[%s4158_s1 + $0x3a8] sm:$0xff] }
 0x40b   :  { %v3115_v43 = vpack.c.bf16 %v1683_v42, %v1682_v41  ;;  %v1688_v42 = vld [vmem:[%s4158_s1 + $0x2b0] sm:$0xff] }
 0x40d   :  { %3094 = vmatpush3.bf16.msra.mxu0 %v3093_v44  ;;  %v1714_v44 = vld [vmem:[%s4158_s1 + $0x380] sm:$0xff] }
 0x40e   :  { %3096 = vmatprep.subr.bf16.mxu0 %v3095_v53  ;;  %v3147_v46 = vpack.c.bf16 %v1715_v45, %v1714_v44  ;;  %v1702_v45 = vld [vmem:[%s4158_s1 + $0x320] sm:$0xff] }
 0x411   :  { %3098 = vmatpush3.bf16.msra.mxu0 %v3097_v56 }
 0x4d7   :  { %v2875_v0 = vpop.f32.mrb[24].mxu0 }
 0x4d8   :  { %v1432_v1 = vmul.f32 %v2875_v0, %v2319_v62  ;;  %v1404_v2 = vpop.f32.mrb[25].mxu0  ;;  %v1659_v0 = vld [vmem:[%s4158_s1 + $0x1c8] sm:$0xff] }
 0x4d9   :  { %v1431_v3 = vmul.f32 %v2319_v62, %v1404_v2  ;;  %v1642_v2 = vld [vmem:[%s4158_s1 + $0x140] sm:$0xff] }
 0x4da   :  { %v1440_v4 = vadd.f32 %v2320_v63, %v1432_v1 }
 0x4db   :  { %v1439_v5 = vadd.f32 %v2320_v63, %v1431_v3  ;;  %v2878_v6 = vpop.f32.mrb[26].mxu0  ;;  %v1643_v3 = vld [vmem:[%s4158_s1 + $0x148] sm:$0xff] }
 0x4dc   :  { %v1444_v7 = vmax.f32 %v1440_v4, 0.0  ;;  %v1434_v8 = vmul.f32 %v2878_v6, %v2319_v62  ;;  %v1414_v9 = vpop.f32.mrb[27].mxu0  ;;  %v3101_v4 = vpack.c.bf16 %v1643_v3, %v1642_v2  ;;  %v1629_v6 = vld [vmem:[%s4158_s1 + $0xd8] sm:$0xff] }
 0x4dd   :  { %v1443_v10 = vmax.f32 %v1439_v5, 0.0  ;;  %v1433_v11 = vmul.f32 %v2319_v62, %v1414_v9  ;;  %v3069_v62 = vpack.c.bf16 %v1611_v61, %v1610_v60  ;;  %v1628_v5 = vld [vmem:[%s4158_s1 + $0xd0] sm:$0xff]  ;;  %v1613_v9 = vld [vmem:[%s4158_s1 + $0x58] sm:$0xff] }
 0x4de   :  { %v1442_v12 = vadd.f32 %v2320_v63, %v1434_v8  ;;  %v1612_v8 = vld [vmem:[%s4158_s1 + $0x50] sm:$0xff] }
 0x4df   :  { %v1441_v13 = vadd.f32 %v2320_v63, %v1433_v11  ;;  %v3043_v14 = vpack.c.bf16 %v1444_v7, %v1443_v10  ;;  %v1658_v63 = vld [vmem:[%s4158_s1 + $0x1c0] sm:$0xff]  ;;  %v3071_v7 = vpack.c.bf16 %v1629_v6, %v1628_v5  ;;  %v3073_v10 = vpack.c.bf16 %v1613_v9, %v1612_v8  ;;  %v1660_v11 = vld [vmem:[%s4158_s1 + $0x1d0] sm:$0xff]  ;;  %v1667_v8 = vld [vmem:[%s4158_s1 + $0x208] sm:$0xff] }
 0x4e0   :  { %v1446_v15 = vmax.f32 %v1442_v12, 0.0  ;;  %v3099_v1 = vpack.c.bf16 %v1659_v0, %v1658_v63  ;;  %v1661_v12 = vld [vmem:[%s4158_s1 + $0x1d8] sm:$0xff] }
 0x4e1   :  { %v1445_v20 = vmax.f32 %v1441_v13, 0.0  ;;  %3044 = vmatprep.subr.bf16.mxu1 %v3043_v14  ;;  %v3103_v13 = vpack.c.bf16 %v1661_v12, %v1660_v11  ;;  %v1684_v12 = vld [vmem:[%s4158_s1 + $0x290] sm:$0xff] }
 0x4e2   :  { %3046 = vmatpush3.bf16.msra.mxu1 %v3043_v14  ;;  %3100 = vmatprep.subr.bf16.mxu0 %v3099_v1  ;;  %v1644_v14 = vld [vmem:[%s4158_s1 + $0x150] sm:$0xff] }
 0x4e3   :  { %v3047_v21 = vpack.c.bf16 %v1446_v15, %v1445_v20  ;;  %3102 = vmatpush3.bf16.msra.mxu0 %v3101_v4  ;;  %v1645_v15 = vld [vmem:[%s4158_s1 + $0x158] sm:$0xff]  ;;  %v1631_v20 = vld [vmem:[%s4158_s1 + $0xe8] sm:$0xff] }
 0x4e4   :  { %v3105_v17 = vpack.c.bf16 %v1645_v15, %v1644_v14  ;;  %3104 = vmatprep.subr.bf16.mxu0 %v3103_v13  ;;  %v3075_v23 = vpack.c.bf16 %v1631_v20, %v1630_v16  ;;  %v1685_v13 = vld [vmem:[%s4158_s1 + $0x298] sm:$0xff]  ;;  %v1698_v14 = vld [vmem:[%s4158_s1 + $0x300] sm:$0xff]  ;;  %v1699_v15 = vld [vmem:[%s4158_s1 + $0x308] sm:$0xff] }
 0x4e5   :  { %3048 = vmatprep.subr.bf16.mxu1 %v3047_v21 }
 0x4e6   :  { %3050 = vmatpush3.bf16.msra.mxu1 %v3047_v21  ;;  %v1614_v21 = vld [vmem:[%s4158_s1 + $0x60] sm:$0xff] }
 0x4e7   :  { %3052 = vmatprep.subr.bf16.mxu1 %v3051_v22  ;;  %v1615_v22 = vld [vmem:[%s4158_s1 + $0x68] sm:$0xff]  ;;  %3106 = vmatpush3.bf16.msra.mxu0 %v3105_v17 }
 0x4e8   :  { %v3077_v24 = vpack.c.bf16 %v1615_v22, %v1614_v21  ;;  %v1716_v21 = vld [vmem:[%s4158_s1 + $0x390] sm:$0xff]  ;;  %v1717_v22 = vld [vmem:[%s4158_s1 + $0x398] sm:$0xff] }
 0x4e9   :  { %2888 = vmatmul.mubr.msk.f32.vlgmr.msra.gmra.mrb[28].mxu1 %vm510_vm2, %v1448_v27  ;;  %v1646_v27 = vld [vmem:[%s4158_s1 + $0x160] sm:$0xff] }
 0x4ea   :  { %2890 = vmatprep.mubr.msk.f32.mxu1 %vm510_vm2, %v1449_v29  ;;  %3054 = vmatpush3.bf16.msra.mxu1 %v3053_v28  ;;  %v3107_v28 = vpack.c.bf16 %v1663_v26, %v1662_v25  ;;  %v1647_v29 = vld [vmem:[%s4158_s1 + $0x168] sm:$0xff]  ;;  %v1668_v25 = vld [vmem:[%s4158_s1 + $0x210] sm:$0xff]  ;;  %v1669_v26 = vld [vmem:[%s4158_s1 + $0x218] sm:$0xff] }
 0x4eb   :  { %3056 = vmatprep.subr.bf16.mxu1 %v3055_v30  ;;  %v1632_v30 = vld [vmem:[%s4158_s1 + $0xf0] sm:$0xff]  ;;  %v3109_v19 = vpack.c.bf16 %v1647_v29, %v1646_v27  ;;  %v3149_v29 = vpack.c.bf16 %v1699_v15, %v1698_v14  ;;  %v1694_v14 = vld [vmem:[%s4158_s1 + $0x2e0] sm:$0xff]  ;;  %v1695_v15 = vld [vmem:[%s4158_s1 + $0x2e8] sm:$0xff] }
 0x4ec   :  { %3108 = vmatprep.subr.bf16.mxu0 %v3107_v28 }
 0x4ed   :  { %2891 = vmatmul.mubr.msk.f32.gmra.mrb[30].mxu1 %vm510_vm2, %v1450_v31  ;;  %v3079_v31 = vpack.c.bf16 %v1633_v18, %v1632_v30  ;;  %3110 = vmatpush3.bf16.msra.mxu0 %v3109_v19  ;;  %v1686_v30 = vld [vmem:[%s4158_s1 + $0x2a0] sm:$0xff]  ;;  %v1687_v18 = vld [vmem:[%s4158_s1 + $0x2a8] sm:$0xff]  ;;  %v3151_v19 = vpack.c.bf16 %v1717_v22, %v1716_v21 }
 0x4ee   :  { %3058 = vmatpush3.bf16.msra.mxu1 %v3057_v32  ;;  %v1616_v32 = vld [vmem:[%s4158_s1 + $0x70] sm:$0xff]  ;;  %3112 = vmatprep.subr.bf16.mxu0 %v3111_v39  ;;  %v1671_v39 = vld [vmem:[%s4158_s1 + $0x228] sm:$0xff]  ;;  %v1726_v22 = vld [vmem:[%s4158_s1 + $0x3e0] sm:$0xff] }
 0x4ef   :  { %3060 = vmatprep.subr.bf16.mxu1 %v3059_v35  ;;  %v3081_v35 = vpack.c.bf16 %v1617_v33, %v1616_v32  ;;  %v1701_v32 = vld [vmem:[%s4158_s1 + $0x318] sm:$0xff]  ;;  %v3121_v33 = vpack.c.bf16 %v1669_v26, %v1668_v25  ;;  %v3139_v25 = vpack.c.bf16 %v1695_v15, %v1694_v14  ;;  %v1678_v26 = vld [vmem:[%s4158_s1 + $0x260] sm:$0xff]  ;;  %v2158_v14 = vld [vmem:[%s4159_s2 + $0x170] sm:$0xff] }
 0x4f2   :  { %3062 = vmatpush3.bf16.msra.mxu1 %v3061_v38  ;;  %v1649_v38 = vld [vmem:[%s4158_s1 + $0x178] sm:$0xff] }
 0x4f3   :  { %3064 = vmatprep.subr.bf16.mxu1 %v3063_v47  ;;  %v3113_v40 = vpack.c.bf16 %v1649_v38, %v1648_v37  ;;  %v3252_v47 = vmov 1983009808   ;;  %v3123_v37 = vpack.c.bf16 %v1687_v18, %v1686_v30  ;;  %v1670_v38 = vld [vmem:[%s4158_s1 + $0x220] sm:$0xff]  ;;  %v1696_v30 = vld [vmem:[%s4158_s1 + $0x2f0] sm:$0xff]  ;;  %v1697_v18 = vld [vmem:[%s4158_s1 + $0x2f8] sm:$0xff] }
 0x4f4   :  { %v1553_v48 = vunpack.c.l.s4 %v3252_v47  ;;  %v3125_v47 = vpack.c.bf16 %v1671_v39, %v1670_v38  ;;  %v1681_v38 = vld [vmem:[%s4158_s1 + $0x278] sm:$0xff] }
 0x4f5   :  { %3114 = vmatpush3.bf16.msra.mxu0 %v3113_v40 }
 0x4f6   :  { %3066 = vmatpush3.bf16.msra.mxu1 %v3065_v50  ;;  %3148 = vmatprep.subr.bf16.mxu0 %v3147_v46  ;;  %v1554_v50 = vunpack.c.0.s8 %v1553_v48  ;;  %v1703_v46 = vld [vmem:[%s4158_s1 + $0x328] sm:$0xff]  ;;  %v1720_v48 = vld [vmem:[%s4158_s1 + $0x3b0] sm:$0xff] }
 0x4f7   :  { %3068 = vmatprep.subr.bf16.mxu1 %v3067_v59 }
 0x4f8   :  { %v1557_v54 = vsub.s32 %v1554_v50, %v1556_v51  ;;  %v1672_v51 = vld [vmem:[%s4158_s1 + $0x230] sm:$0xff] }
 0x4fa   :  { %3070 = vmatpush3.bf16.msra.mxu1 %v3069_v62 }
 0x4fb   :  { %3072 = vmatprep.subr.bf16.mxu1 %v3071_v7  ;;  %v1666_v7 = vld [vmem:[%s4158_s1 + $0x200] sm:$0xff] }
 0x4fc   :  { %v3117_v17 = vpack.c.bf16 %v1667_v8, %v1666_v7  ;;  %v1724_v8 = vld [vmem:[%s4158_s1 + $0x3d0] sm:$0xff] }
 0x4fe   :  { %3074 = vmatpush3.bf16.msra.mxu1 %v3073_v10 }
 0x4ff   :  { %3076 = vmatprep.subr.bf16.mxu1 %v3075_v23 }
 0x502   :  { %3078 = vmatpush3.bf16.msra.mxu1 %v3077_v24  ;;  %v3119_v24 = vpack.c.bf16 %v1685_v13, %v1684_v12  ;;  %v1677_v12 = vld [vmem:[%s4158_s1 + $0x258] sm:$0xff] }
 0x503   :  { %3080 = vmatprep.subr.bf16.mxu1 %v3079_v31  ;;  %v1700_v31 = vld [vmem:[%s4158_s1 + $0x310] sm:$0xff] }
 0x504   :  { %v3153_v41 = vpack.c.bf16 %v1701_v32, %v1700_v31  ;;  %v1710_v31 = vld [vmem:[%s4158_s1 + $0x360] sm:$0xff]  ;;  %v1711_v32 = vld [vmem:[%s4158_s1 + $0x368] sm:$0xff] }
 0x505   :  { %v3173_v39 = vpack.c.bf16 %v1711_v32, %v1710_v31 }
 0x506   :  { %3082 = vmatpush3.bf16.msra.mxu1 %v3081_v35  ;;  %v1718_v35 = vld [vmem:[%s4158_s1 + $0x3a0] sm:$0xff] }
 0x507   :  { %3116 = vmatprep.subr.bf16.mxu1 %v3115_v43  ;;  %v1689_v43 = vld [vmem:[%s4158_s1 + $0x2b8] sm:$0xff]  ;;  %v3155_v44 = vpack.c.bf16 %v1719_v36, %v1718_v35  ;;  %v3143_v36 = vpack.c.bf16 %v1697_v18, %v1696_v30  ;;  %v2332_v30 = vld [vmem:[%s4159_s2 + $0x192] ss:$0 sm:$0xff] }
 0x508   :  { %v3127_v50 = vpack.c.bf16 %v1689_v43, %v1688_v42  ;;  %v1729_v35 = vld [vmem:[%s4158_s1 + $0x3f8] sm:$0xff] }
 0x509   :  { %v1713_v42 = vld [vmem:[%s4158_s1 + $0x378] sm:$0xff] }
 0x5bc   :  { %v2889_v52 = vpop.f32.mrb[28].mxu1 }
 0x5bd   :  { %v1529_v53 = vpop.f32.mrb[29].mxu1 }
 0x5c0   :  { %v2892_v55 = vpop.f32.mrb[30].mxu1 }
 0x5c1   :  { %v1549_v56 = vmax.f32 %v2889_v52, %v2892_v55  ;;  %v1539_v57 = vpop.f32.mrb[31].mxu1  ;;  %v1673_v52 = vld [vmem:[%s4158_s1 + $0x238] sm:$0xff]  ;;  %v1691_v55 = vld [vmem:[%s4158_s1 + $0x2c8] sm:$0xff] }
 0x5c2   :  { %v1548_v58 = vmax.f32 %v1529_v53, %v1539_v57  ;;  %v3157_v53 = vpack.c.bf16 %v1703_v46, %v1702_v45  ;;  %v1704_v57 = vld [vmem:[%s4158_s1 + $0x330] sm:$0xff]  ;;  %v2065_v45 = vld [vmem:[%s4159_s2 + $0x128] sm:$0xff] }
 0x5c3   :  { %1575 = vst [vmem:[#allocation2 + $0x8] sm:$0x3] %v1549_v56  ;;  %v1583_v59 = vrot.slane %v1549_v56, %v1557_v54  ;;  %v1587_v60 = vcombine.high %v1549_v56, %v1549_v56  ;;  %v3159_v56 = vpack.c.bf16 %v1721_v49, %v1720_v48  ;;  %v2066_v46 = vld [vmem:[%s4159_s2 + $0x130] sm:$0xff]  ;;  %v2067_v49 = vld [vmem:[%s4159_s2 + $0x138] sm:$0xff] }
 0x5c4   :  { %1550 = vst [vmem:[#allocation2] sm:$0x3] %v1548_v58  ;;  %v1558_v61 = vrot.slane %v1548_v58, %v1557_v54  ;;  %v1562_v62 = vcombine.high %v1548_v58, %v1548_v58  ;;  %v1705_v58 = vld [vmem:[%s4158_s1 + $0x338] sm:$0xff]  ;;  %v3180_v48 = vpack.c.bf16 %v2066_v46, %v2065_v45 }
 0x5c5   :  { %v1584_v63 = vcombine.high %v1583_v59, %v1583_v59  ;;  %v1594_v0 = vrot.slane %v1587_v60, %v1557_v54  ;;  %2326 = vst.sshfl [vmem:[#allocation2 + $0xc] sm:$0x3 pattern:$0x76325410] %v1587_v60  ;;  %v3129_v59 = vpack.c.bf16 %v1673_v52, %v1672_v51  ;;  %v1722_v60 = vld [vmem:[%s4158_s1 + $0x3c0] sm:$0xff]  ;;  %v2070_v51 = vld [vmem:[%s4159_s2 + $0x150] sm:$0xff] }
 0x5c6   :  { %v1559_v1 = vcombine.high %v1558_v61, %v1558_v61  ;;  %v1569_v2 = vrot.slane %v1562_v62, %v1557_v54  ;;  %2325 = vst.sshfl [vmem:[#allocation2 + $0x4] sm:$0x3 pattern:$0x76325410] %v1562_v62  ;;  %v1723_v61 = vld [vmem:[%s4158_s1 + $0x3c8] sm:$0xff] }
 0x5c7   :  { %1586 = vst [vmem:[#allocation2 + $0xa] sm:$0x3] %v1584_v63  ;;  %v1597_v3 = vcombine.high %v1594_v0, %v1594_v0  ;;  %v1674_v63 = vld [vmem:[%s4158_s1 + $0x240] sm:$0xff]  ;;  %v1675_v0 = vld [vmem:[%s4158_s1 + $0x248] sm:$0xff] }
 0x5c8   :  { %1561 = vst [vmem:[#allocation2 + $0x2] sm:$0x3] %v1559_v1  ;;  %v1572_v4 = vcombine.high %v1569_v2, %v1569_v2  ;;  %v3161_v1 = vpack.c.bf16 %v1705_v58, %v1704_v57  ;;  %v1692_v2 = vld [vmem:[%s4158_s1 + $0x2d0] sm:$0xff]  ;;  %v3133_v7 = vpack.c.bf16 %v1675_v0, %v1674_v63 }
 0x5c9   :  { %1599 = vst [vmem:[#allocation2 + $0xe] sm:$0x3] %v1597_v3  ;;  %v1693_v3 = vld [vmem:[%s4158_s1 + $0x2d8] sm:$0xff] }
 0x5ca   :  { %1574 = vst [vmem:[#allocation2 + $0x6] sm:$0x3] %v1572_v4  ;;  %v3163_v4 = vpack.c.bf16 %v1723_v61, %v1722_v60 }
 0x5d0   :  { %v1601_v5 = vld [vmem:[#allocation2 + $0x8] sm:$0xff] }
 0x5d1   :  { %v1600_v6 = vld [vmem:[#allocation2] sm:$0xff]  ;;  %v1749_v9 = vcombine.high %v1601_v5, %v1601_v5  ;;  %v3924_v23 = vrot.slane %v1601_v5, %v1557_v54 }
 0x5d2   :  { %v1739_v10 = vrot.slane %v1600_v6, %v1557_v54  ;;  %v1732_v11 = vcombine.high %v1600_v6, %v1600_v6  ;;  %v1706_v5 = vld [vmem:[%s4158_s1 + $0x340] sm:$0xff]  ;;  %v1707_v6 = vld [vmem:[%s4158_s1 + $0x348] sm:$0xff] }
 0x5d3   :  { %v3932_v27 = vrot.slane %v1749_v9, %v1557_v54  ;;  %v1764_v34 = vcombine.high %v3924_v23, %v3924_v23  ;;  %v1725_v9 = vld [vmem:[%s4158_s1 + $0x3d8] sm:$0xff]  ;;  %v3165_v13 = vpack.c.bf16 %v1707_v6, %v1706_v5 }
 0x5d4   :  { %v1747_v16 = vcombine.high %v1739_v10, %v1739_v10  ;;  %v1746_v20 = vrot.slane %v1732_v11, %v1557_v54  ;;  %v1690_v54 = vld [vmem:[%s4158_s1 + $0x2c0] sm:$0xff]  ;;  %v1676_v11 = vld [vmem:[%s4158_s1 + $0x250] sm:$0xff] }
 0x5d5   :  { %v1765_v40 = vcombine.high %v3932_v27, %v3932_v27  ;;  %v3131_v62 = vpack.c.bf16 %v1691_v55, %v1690_v54  ;;  %v3137_v21 = vpack.c.bf16 %v1677_v12, %v1676_v11  ;;  %v2072_v54 = vld [vmem:[%s4159_s2 + $0x160] sm:$0xff] }
 0x5d6   :  { %1838 = vmatprep.mubr.f32.mxu1 %v1747_v16  ;;  %v1748_v28 = vcombine.high %v1746_v20, %v1746_v20  ;;  %v3167_v16 = vpack.c.bf16 %v1725_v9, %v1724_v8  ;;  %v2328_v9 = vld [vmem:[%s4159_s2 + $0x18f] ss:$0 sm:$0xff] }
 0x5d7   :  { %1839 = vmatmul.mubr.f32.vlgmr.msra.gmra.mrb[32].mxu1 %v1739_v10  ;;  %v3135_v10 = vpack.c.bf16 %v1693_v3, %v1692_v2 }
 0x5d8   :  { %3118 = vmatpush3.bf16.msra.mxu1 %v3117_v17  ;;  %1908 = vmatprep.mubr.f32.mxu0 %v1748_v28  ;;  %v1708_v17 = vld [vmem:[%s4158_s1 + $0x350] sm:$0xff]  ;;  %v1679_v28 = vld [vmem:[%s4158_s1 + $0x268] sm:$0xff] }
 0x5d9   :  { %1909 = vmatmul.mubr.f32.vlgmr.msra.gmra.mrb[28].mxu0 %v1746_v20  ;;  %3120 = vmatprep.subr.bf16.mxu1 %v3119_v24  ;;  %v1709_v20 = vld [vmem:[%s4158_s1 + $0x358] sm:$0xff]  ;;  %v1727_v24 = vld [vmem:[%s4158_s1 + $0x3e8] sm:$0xff] }
 0x5da   :  { %3150 = vmatpush3.bf16.msra.mxu0 %v3149_v29  ;;  %1978 = vmatprep.mubr.f32.mxu1 %v1764_v34  ;;  %v3169_v29 = vpack.c.bf16 %v1709_v20, %v1708_v17  ;;  %v1728_v34 = vld [vmem:[%s4158_s1 + $0x3f0] sm:$0xff]  ;;  %v2160_v17 = vld [vmem:[%s4159_s2 + $0x180] sm:$0xff] }
 0x5db   :  { %3152 = vmatprep.subr.bf16.mxu0 %v3151_v19  ;;  %2048 = vmatprep.mubr.f32.mxu0 %v1765_v40  ;;  %v3171_v19 = vpack.c.bf16 %v1727_v24, %v1726_v22  ;;  %v3175_v40 = vpack.c.bf16 %v1729_v35, %v1728_v34  ;;  %v2331_v22 = vld [vmem:[%s4159_s2 + $0x191] ss:$0 sm:$0xff] }
 0x5dc   :  { %3122 = vmatpush3.bf16.msra.mxu1 %v3121_v33  ;;  %v3141_v33 = vpack.c.bf16 %v1679_v28, %v1678_v26 }
 0x5dd   :  { %3124 = vmatprep.subr.bf16.mxu1 %v3123_v37  ;;  %v1680_v37 = vld [vmem:[%s4158_s1 + $0x270] sm:$0xff] }
 0x5de   :  { %3154 = vmatpush3.bf16.msra.mxu0 %v3153_v41  ;;  %v1712_v41 = vld [vmem:[%s4158_s1 + $0x370] sm:$0xff]  ;;  %v3145_v43 = vpack.c.bf16 %v1681_v38, %v1680_v37 }
 0x5df   :  { %3156 = vmatprep.subr.bf16.mxu0 %v3155_v44  ;;  %v3177_v44 = vpack.c.bf16 %v1713_v42, %v1712_v41 }
 0x5e0   :  { %3126 = vmatpush3.bf16.msra.mxu1 %v3125_v47  ;;  %v3253_v47 = vmov 0.0|0.0  }
 0x5e1   :  { %3128 = vmatprep.subr.bf16.mxu1 %v3127_v50  ;;  %v2069_v50 = vld [vmem:[%s4159_s2 + $0x148] sm:$0xff] }
 0x5e2   :  { %3158 = vmatpush3.bf16.msra.mxu0 %v3157_v53  ;;  %v3186_v52 = vpack.c.bf16 %v2070_v51, %v2069_v50  ;;  %v2071_v53 = vld [vmem:[%s4159_s2 + $0x158] sm:$0xff] }
 0x5e3   :  { %3160 = vmatprep.subr.bf16.mxu0 %v3159_v56  ;;  %v3189_v55 = vpack.c.bf16 %v2072_v54, %v2071_v53  ;;  %v3255_v56 = vmov 0.0  }
 0x5e4   :  { %3130 = vmatpush3.bf16.msra.mxu1 %v3129_v59 }
 0x5e5   :  { %3132 = vmatprep.subr.bf16.mxu1 %v3131_v62 }
 0x5e6   :  { %3162 = vmatpush3.bf16.msra.mxu0 %v3161_v1 }
 0x5e7   :  { %3164 = vmatprep.subr.bf16.mxu0 %v3163_v4 }
 0x5e8   :  { %3134 = vmatpush3.bf16.msra.mxu1 %v3133_v7  ;;  %v2327_v7 = vld [vmem:[%s4159_s2 + $0x18e] ss:$0 sm:$0xff] }
 0x5e9   :  { %3136 = vmatprep.subr.bf16.mxu1 %v3135_v10 }
 0x5ea   :  { %3166 = vmatpush3.bf16.msra.mxu0 %v3165_v13  ;;  %v2157_v13 = vld [vmem:[%s4159_s2 + $0x168] sm:$0xff] }
 0x5eb   :  { %3168 = vmatprep.subr.bf16.mxu0 %v3167_v16  ;;  %v3192_v15 = vpack.c.bf16 %v2158_v14, %v2157_v13  ;;  %v2159_v16 = vld [vmem:[%s4159_s2 + $0x178] sm:$0xff] }
 0x5ec   :  { %3138 = vmatpush3.bf16.msra.mxu1 %v3137_v21  ;;  %v3195_v20 = vpack.c.bf16 %v2160_v17, %v2159_v16  ;;  %v2330_v21 = vld [vmem:[%s4159_s2 + $0x190] ss:$0 sm:$0xff] }
 0x5ed   :  { %3140 = vmatprep.subr.bf16.mxu1 %v3139_v25 }
 0x5ee   :  { %3170 = vmatpush3.bf16.msra.mxu0 %v3169_v29 }
 0x5ef   :  { %3172 = vmatprep.subr.bf16.mxu0 %v3171_v19 }
 0x5f0   :  { %3142 = vmatpush3.bf16.msra.mxu1 %v3141_v33 }
 0x5f1   :  { %3144 = vmatprep.subr.bf16.mxu1 %v3143_v36 }
 0x5f2   :  { %3174 = vmatpush3.bf16.msra.mxu0 %v3173_v39 }
 0x5f3   :  { %3176 = vmatprep.subr.bf16.mxu0 %v3175_v40 }
 0x5f4   :  { %3146 = vmatpush3.bf16.msra.mxu1 %v3145_v43 }
 0x5f5   :  { %3179 = vmatprep.subr.bf16.mxu1 %v3253_v47 }
 0x5f6   :  { %3178 = vmatpush3.bf16.msra.mxu0 %v3177_v44 }
 0x5f7   :  { %1979 = vmatmul.mubr.f32.vlgmr.msra.gmra.mrb[34].mxu1 %v3924_v23  ;;  %v2068_v23 = vld [vmem:[%s4159_s2 + $0x140] sm:$0xff] }
 0x5f8   :  { %3181 = vmatpush3.bf16.msra.mxu1 %v3180_v48  ;;  %2909 = vmatprep.mubr.msk.f32.mxu1 %vm3254_vm5, %v3255_v56 }
 0x5f9   :  { %2049 = vmatmul.mubr.f32.vlgmr.msra.gmra.mrb[30].mxu0 %v3932_v27  ;;  %3182 = vmatprep.subr.bf16.mxu1 %v3253_v47  ;;  %v3183_v27 = vpack.c.bf16 %v2068_v23, %v2067_v49 }
 0x5fc   :  { %3184 = vmatpush3.bf16.msra.mxu1 %v3183_v27 }
 0x5fd   :  { %3185 = vmatprep.subr.bf16.mxu1 %v3253_v47 }
 0x600   :  { %3187 = vmatpush3.bf16.msra.mxu1 %v3186_v52 }
 0x601   :  { %3188 = vmatprep.subr.bf16.mxu1 %v3253_v47 }
 0x604   :  { %3190 = vmatpush3.bf16.msra.mxu1 %v3189_v55 }
 0x605   :  { %3191 = vmatprep.subr.bf16.mxu1 %v3253_v47 }
 0x6aa   :  { %v2515_v57 = vpop.f32.mrb[32].mxu1 }
 0x6ab   :  { %v2516_v58 = vpop.f32.mrb[33].mxu1 }
 0x6ac   :  { %v2550_v59 = vpop.f32.mrb[28].mxu0  ;;  %v2517_v60 = vadd.f32 %v2516_v58, %v2515_v57 }
 0x6ad   :  { %v2551_v61 = vpop.f32.mrb[29].mxu0 }
 0x6ae   :  { %v2552_v62 = vadd.f32 %v2551_v61, %v2550_v59 }
 0x6b0   :  { %v1911_v63 = vadd.f32 %v2552_v62, %v2517_v60 }
 0x6ca   :  { %v2585_v0 = vpop.f32.mrb[34].mxu1 }
 0x6cb   :  { %v2586_v1 = vpop.f32.mrb[35].mxu1 }
 0x6cc   :  { %v2587_v2 = vadd.f32 %v2586_v1, %v2585_v0  ;;  %v2620_v3 = vpop.f32.mrb[30].mxu0 }
 0x6cd   :  { %v2621_v4 = vpop.f32.mrb[31].mxu0 }
 0x6ce   :  { %v1981_v5 = vadd.f32 %v2587_v2, %v1911_v63  ;;  %v2622_v6 = vadd.f32 %v2621_v4, %v2620_v3 }
 0x6d0   :  { %v2051_v8 = vadd.f32 %v2622_v6, %v1981_v5 }
 0x6d2   :  { %v2058_v10 = vmul.f32 %v2327_v7, %v2051_v8 }
 0x6d4   :  { %v2063_v11 = vadd.f32 %v2328_v9, %v2058_v10 }
 0x6d6   :  { %v2064_v12 = vmax.f32 %v2063_v11, 0.0 }
 0x6d8   :  { %2910 = vmatmul.mubr.msk.f32.vlgmr.msra.gmra.mrb[36].mxu1 %vm946_vm4, %v2064_v12 }
 0x6d9   :  { %2920 = vmatprep.mubr.msk.f32.mxu1 %vm3254_vm5, %v3255_v56  ;;  %3193 = vmatpush3.bf16.msra.mxu1 %v3192_v15 }
 0x6da   :  { %3194 = vmatprep.subr.bf16.mxu1 %v3253_v47 }
 0x6dd   :  { %3196 = vmatpush3.bf16.msra.mxu1 %v3195_v20 }
 0x7ab   :  { %v2142_v24 = vpop.f32.mrb[36].mxu1 }
 0x7ac   :  { %v2150_v25 = vmul.f32 %v2330_v21, %v2142_v24  ;;  %v2911_v26 = vpop.f32.mrb[37].mxu1 }
 0x7ae   :  { %v2155_v28 = vadd.f32 %v2331_v22, %v2150_v25 }
 0x7b0   :  { %v2156_v29 = vmax.f32 %v2155_v28, 0.0 }
 0x7b2   :  { %2921 = vmatmul.mubr.msk.f32.vlgmr.msra.gmra.mrb[38].mxu1 %vm510_vm2, %v2156_v29 }
 0x885   :  { %v2234_v18 = vpop.f32.mrb[38].mxu1 }
 0x886   :  { %v2235_v19 = vadd.f32 %v2332_v30, %v2234_v18  ;;  %v2922_v31 = vpop.f32.mrb[39].mxu1 }
 0x888   :  { %2238 = vst [vmem:[#allocation3] sm:$0x3] %v2235_v19 }
 0x889   :  { %3239 = shalt.err (!%p3236_p4)
}
 0x88a   :  { %s3240_s12 = scalar_lea.hbm %s4160_s3, 32 }
 0x88b   :  { %p3241_p5 = scmp.ne.s32.totalorder %s4160_s3, %s3240_s12  ;;  %p3244_p6 = scmp.lt.u32.totalorder %s3240_s12, %s4160_s3 }
 0x88d   :  { %p3246_p7 = pnand %p3244_p6, %p3241_p5 }
 0x88f   :  { %3249 = shalt.err (!%p3246_p7)
}
 0x890   :  { %2248 = dma.vmem_to_hbm [thread:$0]  %s2246_s8, 32, %s4160_s3, [#allocation4]  }
 0x891   :  { %3250 = dma.done.wait [#allocation4], 32  }
 0x892   :  { %3251 = vsyncadd [#allocation4], 4294967264 }
 0x893   :  { %2252 = vsyncpa [#allocation4], 1 }

</bundles_post_ra>
